<compile_context>
chip_gen: v6e
topology: v6e:2x2x1
jax: 0.10.0
libtpu: 0.0.40
codegen_flags: <defaults>
</compile_context>

<pallas_src>
import jax
import jax.numpy as jnp
from jax.experimental import pallas as pl
from jax.experimental.pallas import tpu as pltpu

# Logical (torch) dims and lane-padded dims.
D_IN, D_HID, D_OUT = 784, 392, 10
D_HID_P, D_OUT_P = 512, 128


def _round_up(x, m):
    return (x + m - 1) // m * m


def _mlp_kernel(x_ref, w1_ref, b1_ref, w2_ref, b2_ref, w3_ref, b3_ref, o_ref):
    # Layer 1: (bm,784)bf16 @ (784,512)bf16 -> f32, +bias, ReLU.
    h1 = jnp.dot(x_ref[...], w1_ref[...], preferred_element_type=jnp.float32)
    h1 = jnp.maximum(h1 + b1_ref[...], 0.0)
    # Dropout(0.2): identity in eval mode.
    # Layer 2: (bm,512) @ (512,512) -> f32, +bias, ReLU.
    h2 = jnp.dot(h1.astype(jnp.bfloat16), w2_ref[...],
                 preferred_element_type=jnp.float32)
    h2 = jnp.maximum(h2 + b2_ref[...], 0.0)
    # Dropout(0.2): identity in eval mode.
    # Layer 3: (bm,512) @ (512,128) -> f32, +bias (lane-dense 128-wide store).
    out = jnp.dot(h2.astype(jnp.bfloat16), w3_ref[...],
                  preferred_element_type=jnp.float32)
    o_ref[...] = (out + b3_ref[...]).astype(o_ref.dtype)


def _choose_bm(B, block_m):
    """Batch tile: multiple of 8 sublanes, capped at block_m (default 512).
    On v7x (2 TensorCores) the parallel grid axis is the only cross-core
    sharding, so if a large batch would fit in a single tile we split it in
    two to keep both cores busy."""
    bm = min(_round_up(block_m, 8), _round_up(B, 8))
    if B > 256 and B <= bm:
        bm = _round_up(-(-B // 2), 8)
    return bm


def net_forward(x, prepared_params, *, block_m=512, out_dtype=jnp.float32):
    """x: (B, 1, 28, 28) float32 (NCHW, like PyTorch). Returns (B, 10) f32."""
    w1, b1, w2, b2, w3, b3 = prepared_params
    B = x.shape[0]
    # == x.view(-1, 784); stream the MXU operand in bf16 (f32 accumulation
    # happens inside the kernel), halving the dominant activation DMA.
    x2d = x.reshape(B, D_IN).astype(jnp.bfloat16)

    bm = _choose_bm(B, block_m)
    B_pad = _round_up(B, bm)
    x_p = x2d if B_pad == B else jnp.pad(x2d, ((0, B_pad - B), (0, 0)))

    grid = (B_pad // bm,)
    # Constant index_map -> weights/biases stay VMEM-resident, DMA'd once.
    resident = lambda shape: pl.BlockSpec(shape, lambda i: (0, 0))

    out_p = pl.pallas_call(
        _mlp_kernel,
        out_shape=jax.ShapeDtypeStruct((B_pad, D_OUT_P), out_dtype),
        grid=grid,
        in_specs=[
            # x tile streams; last dim 784 equals the full array dim (legal).
            pl.BlockSpec((bm, D_IN), lambda i: (i, 0)),
            resident((D_IN, D_HID_P)), resident((1, D_HID_P)),      # W1, b1
            resident((D_HID_P, D_HID_P)), resident((1, D_HID_P)),   # W2, b2
            resident((D_HID_P, D_OUT_P)), resident((1, D_OUT_P)),   # W3, b3
        ],
        out_specs=pl.BlockSpec((bm, D_OUT_P), lambda i: (i, 0)),
        compiler_params=pltpu.CompilerParams(
            dimension_semantics=("parallel",),
            vmem_limit_bytes=32 << 20,
        ),
    )(x_p, w1, b1, w2, b2, w3, b3)

    return out_p[:B, :D_OUT].astype(jnp.float32)


def init_params(key):
    """Deterministic init mimicking torch.nn.Linear defaults
    (uniform(-1/sqrt(fan_in), 1/sqrt(fan_in)) for weight and bias).
    Weights stored as (in_features, out_features), f32."""
    def linear(key, fan_in, fan_out):
        kw, kb = jax.random.split(key)
        bound = 1.0 / jnp.sqrt(fan_in)
        w = jax.random.uniform(kw, (fan_in, fan_out), jnp.float32, -bound, bound)
        b = jax.random.uniform(kb, (1, fan_out), jnp.float32, -bound, bound)
        return w, b

    k1, k2, k3 = jax.random.split(key, 3)
    w1, b1 = linear(k1, D_IN, D_HID)
    w2, b2 = linear(k2, D_HID, D_HID)
    w3, b3 = linear(k3, D_HID, D_OUT)
    return (w1, b1, w2, b2, w3, b3)


def prepare_params(params):
    """One-time weight prep: zero-pad hidden/output dims to lane-aligned sizes
    (392->512, 10->128) and cast the MXU operands (weights) to bf16.  Biases
    stay f32 (VPU add in f32).  The input dim (784) is NOT padded anymore.
    Zero padding keeps the math exact: padded hidden cols get bias 0 ->
    ReLU(0)=0, padded W rows multiply those zeros, padded output cols are
    sliced off in the wrapper."""
    w1, b1, w2, b2, w3, b3 = params

    def pad2(a, r, c, dtype):
        out = jnp.zeros((r, c), dtype)
        return out.at[:a.shape[0], :a.shape[1]].set(a.astype(dtype))

    w1p = pad2(w1, D_IN, D_HID_P, jnp.bfloat16)
    b1p = pad2(b1, 1, D_HID_P, jnp.float32)
    w2p = pad2(w2, D_HID_P, D_HID_P, jnp.bfloat16)
    b2p = pad2(b2, 1, D_HID_P, jnp.float32)
    w3p = pad2(w3, D_HID_P, D_OUT_P, jnp.bfloat16)
    b3p = pad2(b3, 1, D_OUT_P, jnp.float32)
    return (w1p, b1p, w2p, b2p, w3p, b3p)


def net_forward_ref(x, prepared_params):
    """Pure-JAX f32 reference using the same (bf16-stored) weights."""
    w1, b1, w2, b2, w3, b3 = prepared_params
    h = x.reshape(x.shape[0], D_IN).astype(jnp.float32)
    w1f = w1[:D_IN, :D_HID].astype(jnp.float32)
    w2f = w2[:D_HID, :D_HID].astype(jnp.float32)
    w3f = w3[:D_HID, :D_OUT].astype(jnp.float32)
    h = jnp.maximum(h @ w1f + b1[:, :D_HID], 0.0)
    h = jnp.maximum(h @ w2f + b2[:, :D_HID], 0.0)
    return h @ w3f + b3[:, :D_OUT]


if __name__ == "__main__":
    key = jax.random.PRNGKey(0)
    kx, kp = jax.random.split(key)

    B = 8
    x = jax.random.normal(kx, (B, 1, 28, 28), jnp.float32)  # NCHW, MNIST-like
    params = prepare_params(init_params(kp))

    out = net_forward(x, params)
    out = jax.block_until_ready(out)

    ref = net_forward_ref(x, params)
    assert out.shape == (B, 10)
    # bf16 rounding at the MXU inputs (accumulation is f32) bounds the
    # deviation from the f32 reference to well under this tolerance.
    assert jnp.allclose(out, ref, atol=3e-2, rtol=3e-2), "mismatch vs reference"

    print("KERNEL_OK")
</pallas_src>

<mosaic_0001>
module attributes {stable_mosaic.version = 11 : i64} {
  func.func @_mlp_kernel(%arg0: i32, %arg1: memref<8x784xbf16, #tpu.memory_space<vmem>>, %arg2: memref<784x512xbf16, #tpu.memory_space<vmem>>, %arg3: memref<1x512xf32, #tpu.memory_space<vmem>>, %arg4: memref<512x512xbf16, #tpu.memory_space<vmem>>, %arg5: memref<1x512xf32, #tpu.memory_space<vmem>>, %arg6: memref<512x128xbf16, #tpu.memory_space<vmem>>, %arg7: memref<1x128xf32, #tpu.memory_space<vmem>>, %arg8: memref<8x128xf32, #tpu.memory_space<vmem>>) attributes {dimension_semantics = [#tpu.dimension_semantics<parallel>], iteration_bounds = array<i64: 1>, scalar_prefetch = 0 : i64, scratch_operands = 0 : i64, tpu.core_type = #tpu.core_type<tc>, window_params = [{transform_indices = @transform_0, window_bounds = array<i64: 8, 784>}, {pipeline_mode = #tpu.pipeline_mode<synchronous>, transform_indices = @transform_1, window_bounds = array<i64: 784, 512>}, {pipeline_mode = #tpu.pipeline_mode<synchronous>, transform_indices = @transform_2, window_bounds = array<i64: 1, 512>}, {pipeline_mode = #tpu.pipeline_mode<synchronous>, transform_indices = @transform_3, window_bounds = array<i64: 512, 512>}, {pipeline_mode = #tpu.pipeline_mode<synchronous>, transform_indices = @transform_4, window_bounds = array<i64: 1, 512>}, {pipeline_mode = #tpu.pipeline_mode<synchronous>, transform_indices = @transform_5, window_bounds = array<i64: 512, 128>}, {pipeline_mode = #tpu.pipeline_mode<synchronous>, transform_indices = @transform_6, window_bounds = array<i64: 1, 128>}, {transform_indices = @transform_7, window_bounds = array<i64: 8, 128>}]} {
    %c0 = arith.constant 0 : index
    %c0_0 = arith.constant 0 : index
    %0 = vector.load %arg1[%c0, %c0_0] : memref<8x784xbf16, #tpu.memory_space<vmem>>, vector<8x784xbf16>
    %c0_1 = arith.constant 0 : index
    %c0_2 = arith.constant 0 : index
    %1 = vector.load %arg2[%c0_1, %c0_2] : memref<784x512xbf16, #tpu.memory_space<vmem>>, vector<784x512xbf16>
    %cst = arith.constant dense<0.000000e+00> : vector<8x512xf32>
    %2 = tpu.matmul %0, %1, %cst {dimension_numbers = #tpu.dot_dimension_numbers<[1], [0], [0], [1], [0, 0, 1, 1], [], []>} : vector<8x784xbf16>, vector<784x512xbf16>, vector<8x512xf32> -> vector<8x512xf32>
    %c0_3 = arith.constant 0 : index
    %c0_4 = arith.constant 0 : index
    %3 = vector.load %arg3[%c0_3, %c0_4] : memref<1x512xf32, #tpu.memory_space<vmem>>, vector<1x512xf32>
    %4 = vector.broadcast %3 : vector<1x512xf32> to vector<8x512xf32>
    %5 = arith.addf %2, %4 : vector<8x512xf32>
    %cst_5 = arith.constant 0.000000e+00 : f32
    %6 = vector.broadcast %cst_5 : f32 to vector<8x512xf32>
    %7 = arith.maximumf %5, %6 : vector<8x512xf32>
    %8 = arith.truncf %7 : vector<8x512xf32> to vector<8x512xbf16>
    %c0_6 = arith.constant 0 : index
    %c0_7 = arith.constant 0 : index
    %9 = vector.load %arg4[%c0_6, %c0_7] : memref<512x512xbf16, #tpu.memory_space<vmem>>, vector<512x512xbf16>
    %cst_8 = arith.constant dense<0.000000e+00> : vector<8x512xf32>
    %10 = tpu.matmul %8, %9, %cst_8 {dimension_numbers = #tpu.dot_dimension_numbers<[1], [0], [0], [1], [0, 0, 1, 1], [], []>} : vector<8x512xbf16>, vector<512x512xbf16>, vector<8x512xf32> -> vector<8x512xf32>
    %c0_9 = arith.constant 0 : index
    %c0_10 = arith.constant 0 : index
    %11 = vector.load %arg5[%c0_9, %c0_10] : memref<1x512xf32, #tpu.memory_space<vmem>>, vector<1x512xf32>
    %12 = vector.broadcast %11 : vector<1x512xf32> to vector<8x512xf32>
    %13 = arith.addf %10, %12 : vector<8x512xf32>
    %cst_11 = arith.constant 0.000000e+00 : f32
    %14 = vector.broadcast %cst_11 : f32 to vector<8x512xf32>
    %15 = arith.maximumf %13, %14 : vector<8x512xf32>
    %16 = arith.truncf %15 : vector<8x512xf32> to vector<8x512xbf16>
    %c0_12 = arith.constant 0 : index
    %c0_13 = arith.constant 0 : index
    %17 = vector.load %arg6[%c0_12, %c0_13] : memref<512x128xbf16, #tpu.memory_space<vmem>>, vector<512x128xbf16>
    %cst_14 = arith.constant dense<0.000000e+00> : vector<8x128xf32>
    %18 = tpu.matmul %16, %17, %cst_14 {dimension_numbers = #tpu.dot_dimension_numbers<[1], [0], [0], [1], [0, 0, 1, 1], [], []>} : vector<8x512xbf16>, vector<512x128xbf16>, vector<8x128xf32> -> vector<8x128xf32>
    %c0_15 = arith.constant 0 : index
    %c0_16 = arith.constant 0 : index
    %19 = vector.load %arg7[%c0_15, %c0_16] : memref<1x128xf32, #tpu.memory_space<vmem>>, vector<1x128xf32>
    %20 = vector.broadcast %19 : vector<1x128xf32> to vector<8x128xf32>
    %21 = arith.addf %18, %20 : vector<8x128xf32>
    %c0_17 = arith.constant 0 : index
    %c0_18 = arith.constant 0 : index
    %22 = vector.load %arg8[%c0_17, %c0_18] : memref<8x128xf32, #tpu.memory_space<vmem>>, vector<8x128xf32>
    tpu.vector_store %arg8[%c0_17, %c0_18], %21 {strides = array<i32>} : memref<8x128xf32, #tpu.memory_space<vmem>>, vector<8x128xf32>,
    return
  }
  func.func @transform_0(%arg0: i32) -> (i32, i32) {
    %c0_i32 = arith.constant 0 : i32
    %c0_i32_0 = arith.constant 0 : i32
    return %arg0, %c0_i32 : i32, i32
  }
  func.func @transform_1(%arg0: i32) -> (i32, i32) {
    %c0_i32 = arith.constant 0 : i32
    %c0_i32_0 = arith.constant 0 : i32
    %c0_i32_1 = arith.constant 0 : i32
    return %c0_i32, %c0_i32_0 : i32, i32
  }
  func.func @transform_2(%arg0: i32) -> (i32, i32) {
    %c0_i32 = arith.constant 0 : i32
    %c0_i32_0 = arith.constant 0 : i32
    %c0_i32_1 = arith.constant 0 : i32
    return %c0_i32, %c0_i32_0 : i32, i32
  }
  func.func @transform_3(%arg0: i32) -> (i32, i32) {
    %c0_i32 = arith.constant 0 : i32
    %c0_i32_0 = arith.constant 0 : i32
    %c0_i32_1 = arith.constant 0 : i32
    return %c0_i32, %c0_i32_0 : i32, i32
  }
  func.func @transform_4(%arg0: i32) -> (i32, i32) {
    %c0_i32 = arith.constant 0 : i32
    %c0_i32_0 = arith.constant 0 : i32
    %c0_i32_1 = arith.constant 0 : i32
    return %c0_i32, %c0_i32_0 : i32, i32
  }
  func.func @transform_5(%arg0: i32) -> (i32, i32) {
    %c0_i32 = arith.constant 0 : i32
    %c0_i32_0 = arith.constant 0 : i32
    %c0_i32_1 = arith.constant 0 : i32
    return %c0_i32, %c0_i32_0 : i32, i32
  }
  func.func @transform_6(%arg0: i32) -> (i32, i32) {
    %c0_i32 = arith.constant 0 : i32
    %c0_i32_0 = arith.constant 0 : i32
    %c0_i32_1 = arith.constant 0 : i32
    return %c0_i32, %c0_i32_0 : i32, i32
  }
  func.func @transform_7(%arg0: i32) -> (i32, i32) {
    %c0_i32 = arith.constant 0 : i32
    %c0_i32_0 = arith.constant 0 : i32
    return %arg0, %c0_i32 : i32, i32
  }
}

</mosaic_0001>

<bundles_post_ra>
// kernel: tpu_custom_call.1
= control target key start
LH: loop header
LB: loop body
LE: loop exit
PB: predicated region body
PF: predicated region fallthrough
CT: control target
= control target key end

     0   :  { %12 = vsyncpa [#allocation3], 0  ;;  %s4207_s0 = inlined_call_operand.hbm [shape: bf16[8,784], index: 0, kind: input, shape index: {}]   ;;  %s4208_s1 = inlined_call_operand.hbm [shape: bf16[784,512], index: 1, kind: input, shape index: {}]   ;;  %s4209_s2 = inlined_call_operand.hbm [shape: f32[1,512], index: 2, kind: input, shape index: {}]   ;;  %s4210_s3 = inlined_call_operand.hbm [shape: bf16[512,512], index: 3, kind: input, shape index: {}]   ;;  %s4211_s4 = inlined_call_operand.vmem [shape: f32[1,512], index: 4, kind: input, shape index: {}]   ;;  %s4212_s5 = inlined_call_operand.hbm [shape: bf16[512,128], index: 5, kind: input, shape index: {}]   ;;  %s4213_s6 = inlined_call_operand.vmem [shape: f32[1,128], index: 6, kind: input, shape index: {}]   ;;  %s4214_s7 = inlined_call_operand.hbm [shape: f32[8,128], index: 7, kind: output, shape index: {}]  }
   0x1   :  { %13 = vsyncpa [#allocation6], 0 }
   0x2   :  { %14 = vsyncpa [#allocation9], 0 }
   0x3   :  { %15 = vsyncpa [#allocation4], 0  ;;  %s4056_s24 = smov [#allocation5]  }
   0x4   :  { %s31_s25 = sshll.u32 %s4056_s24, 4  ;;  %s32_s25 = int_to_ptr.vmem [resolvable:$true] %s31_s25 }
   0x5   :  { %s3936_s26 = scalar_lea.vmem %s32_s25, 25088  ;;  %p3941_p1 = scmp.lt.s32.totalorder %s32_s25, %s32_s25 }
   0x6   :  { %p3937_p0 = scmp.ne.s32.totalorder %s32_s25, %s3936_s26  ;;  %p3942_p2 = scmp.lt.s32.totalorder %s3936_s26, %s3936_s26 }
   0x8   :  { %p3943_p3 = por %p3942_p2, %p3941_p1 }
   0xa   :  { %p3944_p4 = pnand %p3943_p3, %p3937_p0 }
   0xc   :  { %3947 = shalt.err (!%p3944_p4)
}
   0xd   :  { %s4057_s27 = smov 256   ;;  %s4058_s28 = smov 16  }
   0xe   :  { %37 = dma.hbm_to_vmem [thread:$0]  %s4208_s1, 25088, %s32_s25, [#allocation6], %s4057_s27, %s4057_s27, %s4058_s28  }
   0xf   :  { %s4059_s8 = smov [#allocation8]   ;;  %s4060_s10 = smov [#allocation2]  }
  0x10   :  { %s53_s9 = sshll.u32 %s4059_s8, 4  ;;  %s22_s11 = sshll.u32 %s4060_s10, 4  ;;  %s54_s9 = int_to_ptr.vmem [resolvable:$true] %s53_s9  ;;  %s23_s11 = int_to_ptr.vmem [resolvable:$true] %s22_s11 }
  0x11   :  { %s3956_s12 = scalar_lea.vmem %s54_s9, 16384  ;;  %p3961_p6 = scmp.lt.s32.totalorder %s54_s9, %s54_s9 }
  0x12   :  { %p3957_p5 = scmp.ne.s32.totalorder %s54_s9, %s3956_s12  ;;  %p3962_p7 = scmp.lt.s32.totalorder %s3956_s12, %s3956_s12 }
  0x14   :  { %p3963_p8 = por %p3962_p7, %p3961_p6 }
  0x16   :  { %p3964_p9 = pnand %p3963_p8, %p3957_p5 }
  0x18   :  { %3967 = shalt.err (!%p3964_p9)
}
  0x19   :  { %59 = dma.hbm_to_vmem [thread:$0]  %s4210_s3, 16384, %s54_s9, [#allocation9], %s4057_s27, %s4057_s27, %s4058_s28  }
  0x1a   :  { %s3976_s15 = scalar_lea.vmem %s23_s11, 448  ;;  %p3981_p11 = scmp.lt.s32.totalorder %s23_s11, %s23_s11 }
  0x1b   :  { %p3977_p10 = scmp.ne.s32.totalorder %s23_s11, %s3976_s15  ;;  %p3982_p12 = scmp.lt.s32.totalorder %s3976_s15, %s3976_s15 }
  0x1d   :  { %p3983_p13 = por %p3982_p12, %p3981_p11 }
  0x1f   :  { %p3984_p0 = pnand %p3983_p13, %p3977_p10 }
  0x21   :  { %3987 = shalt.err (!%p3984_p0)
}
  0x22   :  { %25 = dma.hbm_to_vmem [thread:$0]  %s4207_s0, 448, %s23_s11, [#allocation3]  }
  0x23   :  { %s4061_s17 = smov [#allocation7]   ;;  %s4062_s19 = smov [#allocation10]  }
  0x24   :  { %s44_s18 = sshll.u32 %s4061_s17, 4  ;;  %s67_s20 = sshll.u32 %s4062_s19, 4  ;;  %s45_s18 = int_to_ptr.vmem [resolvable:$true] %s44_s18  ;;  %s68_s20 = int_to_ptr.vmem [resolvable:$true] %s67_s20 }
  0x25   :  { %s3996_s21 = scalar_lea.vmem %s45_s18, 64  ;;  %p4001_p2 = scmp.lt.s32.totalorder %s45_s18, %s45_s18 }
  0x26   :  { %p3997_p1 = scmp.ne.s32.totalorder %s45_s18, %s3996_s21  ;;  %p4002_p3 = scmp.lt.s32.totalorder %s3996_s21, %s3996_s21 }
  0x28   :  { %p4003_p4 = por %p4002_p3, %p4001_p2 }
  0x2a   :  { %p4004_p5 = pnand %p4003_p4, %p3997_p1 }
  0x2c   :  { %4007 = shalt.err (!%p4004_p5)
}
  0x2d   :  { %47 = dma.hbm_to_vmem [thread:$0]  %s4209_s2, 64, %s45_s18, [#allocation6]  }
  0x2e   :  { %s4016_s23 = scalar_lea.vmem %s68_s20, 4096  ;;  %p4021_p7 = scmp.lt.s32.totalorder %s68_s20, %s68_s20 }
  0x2f   :  { %p4017_p6 = scmp.ne.s32.totalorder %s68_s20, %s4016_s23  ;;  %p4022_p8 = scmp.lt.s32.totalorder %s4016_s23, %s4016_s23 }
  0x31   :  { %p4023_p9 = por %p4022_p8, %p4021_p7 }
  0x33   :  { %p4024_p10 = pnand %p4023_p9, %p4017_p6 }
  0x35   :  { %4027 = shalt.err (!%p4024_p10)
}
  0x36   :  { %s4063_s0 = smov 64   ;;  %s4064_s24 = smov 4  }
  0x37   :  { %73 = dma.hbm_to_vmem [thread:$0]  %s4212_s5, 4096, %s68_s20, [#allocation9], %s4063_s0, %s4063_s0, %s4064_s24  }
  0x38   :  { %4048 = dma.done.wait [#allocation3], 448  }
  0x39   :  { %4049 = vsyncadd [#allocation3], 4294966848 }
  0x3a   :  { %4050 = dma.done.wait [#allocation6], 25152  }
  0x3b   :  { %4051 = vsyncadd [#allocation6], 4294942144 }
  0x3c   :  { %4052 = dma.done.wait [#allocation9], 20480  }
  0x3d   :  { %4053 = vsyncadd [#allocation9], 4294946816  ;;  %v3402_v0 = vld [vmem:[#allocation5 + $0xe4] ss:$16 sps:$4 sm:$0xff]   ;;  %v3406_v2 = vld [vmem:[#allocation5 + $0xe0] ss:$16 sps:$4 sm:$0xff]  }
  0x3e   :  { %v3404_v1 = vld [vmem:[#allocation5 + $0x2e4] ss:$16 sps:$4 sm:$0xff]   ;;  %1322 = vmatprep.subr.bf16.mxu0 %v3402_v0  ;;  %v3407_v3 = vld [vmem:[#allocation5 + $0x2e0] ss:$16 sps:$4 sm:$0xff]   ;;  %vm1318_vm0 = vcmask 130048   ;;  %s4066_s28 = smov [#allocation11]  }
  0x3f   :  { %1363 = vmatprep.subr.bf16.mxu1 %v3404_v1  ;;  %v3408_v4 = vld [vmem:[#allocation5 + $0xc4] ss:$16 sps:$4 sm:$0xff]   ;;  %1323 = vmatpush1.bf16.msra.mxu0 %v3406_v2  ;;  %v3412_v6 = vld [vmem:[#allocation5 + $0xc0] ss:$16 sps:$4 sm:$0xff]   ;;  %s2970_s29 = sshll.u32 %s4066_s28, 4  ;;  %s2971_s29 = int_to_ptr.vmem [resolvable:$true] %s2970_s29 }
  0x40   :  { %1364 = vmatpush1.bf16.msra.mxu1 %v3407_v3  ;;  %v3410_v5 = vld [vmem:[#allocation5 + $0x2c4] ss:$16 sps:$4 sm:$0xff]   ;;  %1324 = vmatprep.subr.bf16.mxu0 %v3408_v4  ;;  %v3413_v7 = vld [vmem:[#allocation5 + $0x2c0] ss:$16 sps:$4 sm:$0xff]   ;;  %s4028_s30 = scalar_lea.vmem %s2971_s29, 128  ;;  %p4033_p12 = scmp.lt.s32.totalorder %s2971_s29, %s2971_s29 }
  0x41   :  { %1365 = vmatprep.subr.bf16.mxu1 %v3410_v5  ;;  %v3414_v8 = vld [vmem:[#allocation5 + $0xa4] ss:$16 sps:$4 sm:$0xff]   ;;  %v3418_v10 = vld [vmem:[#allocation5 + $0xa0] ss:$16 sps:$4 sm:$0xff]   ;;  %p4029_p11 = scmp.ne.s32.totalorder %s2971_s29, %s4028_s30  ;;  %p4034_p13 = scmp.lt.s32.totalorder %s4028_s30, %s4028_s30 }
  0x42   :  { %v3416_v9 = vld [vmem:[#allocation5 + $0x2a4] ss:$16 sps:$4 sm:$0xff]   ;;  %v3419_v11 = vld [vmem:[#allocation5 + $0x2a0] ss:$16 sps:$4 sm:$0xff]  }
  0x43   :  { %1325 = vmatpush1.bf16.msra.mxu0 %v3412_v6  ;;  %v3420_v12 = vld [vmem:[#allocation5 + $0x84] ss:$16 sps:$4 sm:$0xff]   ;;  %v3424_v14 = vld [vmem:[#allocation5 + $0x80] ss:$16 sps:$4 sm:$0xff]   ;;  %p4035_p0 = por %p4034_p13, %p4033_p12 }
  0x44   :  { %1366 = vmatpush1.bf16.msra.mxu1 %v3413_v7  ;;  %1326 = vmatprep.subr.bf16.mxu0 %v3414_v8  ;;  %v3422_v13 = vld [vmem:[#allocation5 + $0x284] ss:$16 sps:$4 sm:$0xff]   ;;  %v3425_v15 = vld [vmem:[#allocation5 + $0x280] ss:$16 sps:$4 sm:$0xff]  }
  0x45   :  { %1367 = vmatprep.subr.bf16.mxu1 %v3416_v9  ;;  %v3426_v16 = vld [vmem:[#allocation5 + $0x64] ss:$16 sps:$4 sm:$0xff]   ;;  %v3430_v18 = vld [vmem:[#allocation5 + $0x60] ss:$16 sps:$4 sm:$0xff]   ;;  %p4036_p1 = pnand %p4035_p0, %p4029_p11 }
  0x46   :  { %v3428_v17 = vld [vmem:[#allocation5 + $0x264] ss:$16 sps:$4 sm:$0xff]   ;;  %v3431_v19 = vld [vmem:[#allocation5 + $0x260] ss:$16 sps:$4 sm:$0xff]  }
  0x47   :  { %1327 = vmatpush1.bf16.msra.mxu0 %v3418_v10  ;;  %v3432_v20 = vld [vmem:[#allocation5 + $0x44] ss:$16 sps:$4 sm:$0xff]   ;;  %v3436_v22 = vld [vmem:[#allocation5 + $0x40] ss:$16 sps:$4 sm:$0xff]  }
  0x48   :  { %1368 = vmatpush1.bf16.msra.mxu1 %v3419_v11  ;;  %1328 = vmatprep.subr.bf16.mxu0 %v3420_v12  ;;  %v3434_v21 = vld [vmem:[#allocation5 + $0x244] ss:$16 sps:$4 sm:$0xff]   ;;  %v3437_v23 = vld [vmem:[#allocation5 + $0x240] ss:$16 sps:$4 sm:$0xff]   ;;  %v3513_v11 = vld [vmem:[#allocation5 + $0xec] ss:$16 sps:$4 sm:$0xff]  }
  0x49   :  { %1369 = vmatprep.subr.bf16.mxu1 %v3422_v13  ;;  %v3438_v24 = vld [vmem:[#allocation5 + $0x24] ss:$16 sps:$4 sm:$0xff]   ;;  %v3442_v26 = vld [vmem:[#allocation5 + $0x20] ss:$16 sps:$4 sm:$0xff]   ;;  %v4065_v13 = vmov 0  }
  0x4a   :  { %v3440_v25 = vld [vmem:[#allocation5 + $0x224] ss:$16 sps:$4 sm:$0xff]   ;;  %v3443_v27 = vld [vmem:[#allocation5 + $0x220] ss:$16 sps:$4 sm:$0xff]  }
  0x4b   :  { %1329 = vmatpush1.bf16.msra.mxu0 %v3424_v14  ;;  %v3444_v28 = vld [vmem:[#allocation5 + $0x4] ss:$16 sps:$4 sm:$0xff]   ;;  %v3448_v30 = vld [vmem:[#allocation5] ss:$16 sps:$4 sm:$0xff]  }
  0x4c   :  { %1370 = vmatpush1.bf16.msra.mxu1 %v3425_v15  ;;  %1330 = vmatprep.subr.bf16.mxu0 %v3426_v16  ;;  %v3446_v29 = vld [vmem:[#allocation5 + $0x204] ss:$16 sps:$4 sm:$0xff]   ;;  %v3449_v31 = vld [vmem:[#allocation5 + $0x200] ss:$16 sps:$4 sm:$0xff]   ;;  %v3511_v15 = vld [vmem:[#allocation5 + $0xe8] ss:$16 sps:$4 sm:$0xff]  }
  0x4d   :  { %1371 = vmatprep.subr.bf16.mxu1 %v3428_v17  ;;  %v3450_v32 = vld [vmem:[#allocation5 + $0x1e4] ss:$16 sps:$4 sm:$0xff]   ;;  %v3454_v34 = vld [vmem:[#allocation5 + $0x1e0] ss:$16 sps:$4 sm:$0xff]   ;;  %v3517_v17 = vld [vmem:[#allocation2 + $0x18] ss:$0 sps:$4 sm:$0xff]  }
  0x4e   :  { %v3452_v33 = vld [vmem:[#allocation5 + $0x3e4] ss:$16 sps:$4 sm:$0xff]   ;;  %v3455_v35 = vld [vmem:[#allocation5 + $0x3e0] ss:$16 sps:$4 sm:$0xff]  }
  0x4f   :  { %1331 = vmatpush1.bf16.msra.mxu0 %v3430_v18  ;;  %v3456_v36 = vld [vmem:[#allocation5 + $0x1c4] ss:$16 sps:$4 sm:$0xff]   ;;  %v3460_v38 = vld [vmem:[#allocation5 + $0x1c0] ss:$16 sps:$4 sm:$0xff]   ;;  %v3520_v18 = vld [vmem:[#allocation5 + $0xcc] ss:$16 sps:$4 sm:$0xff]  }
  0x50   :  { %1372 = vmatpush1.bf16.msra.mxu1 %v3431_v19  ;;  %1332 = vmatprep.subr.bf16.mxu0 %v3432_v20  ;;  %v3458_v37 = vld [vmem:[#allocation5 + $0x3c4] ss:$16 sps:$4 sm:$0xff]   ;;  %v3461_v39 = vld [vmem:[#allocation5 + $0x3c0] ss:$16 sps:$4 sm:$0xff]   ;;  %v3518_v20 = vld [vmem:[#allocation5 + $0xc8] ss:$16 sps:$4 sm:$0xff]  }
  0x51   :  { %1373 = vmatprep.subr.bf16.mxu1 %v3434_v21  ;;  %v3462_v40 = vld [vmem:[#allocation5 + $0x1a4] ss:$16 sps:$4 sm:$0xff]   ;;  %v3466_v42 = vld [vmem:[#allocation5 + $0x1a0] ss:$16 sps:$4 sm:$0xff]  }
  0x52   :  { %v3464_v41 = vld [vmem:[#allocation5 + $0x3a4] ss:$16 sps:$4 sm:$0xff]   ;;  %v3467_v43 = vld [vmem:[#allocation5 + $0x3a0] ss:$16 sps:$4 sm:$0xff]  }
  0x53   :  { %1333 = vmatpush1.bf16.msra.mxu0 %v3436_v22  ;;  %v3468_v44 = vld [vmem:[#allocation5 + $0x184] ss:$16 sps:$4 sm:$0xff]   ;;  %v93_v48 = vld [vmem:[#allocation2 + $0x8] sm:$0xff] }
  0x54   :  { %1374 = vmatpush1.bf16.msra.mxu1 %v3437_v23  ;;  %1334 = vmatprep.subr.bf16.mxu0 %v3438_v24  ;;  %v3470_v45 = vld [vmem:[#allocation5 + $0x384] ss:$16 sps:$4 sm:$0xff]   ;;  %v3472_v49 = vld [vmem:[#allocation5 + $0x180] ss:$16 sps:$4 sm:$0xff]   ;;  %v4124_v51 = vcombine.high %v93_v48, %v93_v48  ;;  %v4130_v7 = vcombine.low %v93_v48, %v93_v48  ;;  %v3526_v22 = vld [vmem:[#allocation5 + $0xac] ss:$16 sps:$4 sm:$0xff]  }
  0x55   :  { %1375 = vmatprep.subr.bf16.mxu1 %v3440_v25  ;;  %v92_v46 = vld [vmem:[#allocation2] sm:$0xff]  ;;  %v3473_v50 = vld [vmem:[#allocation5 + $0x380] ss:$16 sps:$4 sm:$0xff]   ;;  %v3562_v48 = vld [vmem:[#allocation5 + $0x1ec] ss:$16 sps:$4 sm:$0xff]  }
  0x56   :  { %v4122_v47 = vcombine.high %v92_v46, %v92_v46  ;;  %v3474_v52 = vld [vmem:[#allocation5 + $0x164] ss:$16 sps:$4 sm:$0xff]   ;;  %1395 = vmatprep.mubr.bf16.mxu1 %v4124_v51  ;;  %v3478_v54 = vld [vmem:[#allocation5 + $0x160] ss:$16 sps:$4 sm:$0xff]   ;;  %v4128_v6 = vcombine.low %v92_v46, %v92_v46  ;;  %v3524_v24 = vld [vmem:[#allocation5 + $0xa8] ss:$16 sps:$4 sm:$0xff]  }
  0x57   :  { %1335 = vmatpush1.bf16.msra.mxu0 %v3442_v26  ;;  %v3476_v53 = vld [vmem:[#allocation5 + $0x364] ss:$16 sps:$4 sm:$0xff]   ;;  %v3479_v55 = vld [vmem:[#allocation5 + $0x360] ss:$16 sps:$4 sm:$0xff]   ;;  %v3532_v26 = vld [vmem:[#allocation5 + $0x8c] ss:$16 sps:$4 sm:$0xff]  }
  0x58   :  { %1376 = vmatpush1.bf16.msra.mxu1 %v3443_v27  ;;  %1336 = vmatprep.subr.bf16.mxu0 %v3444_v28  ;;  %v3480_v56 = vld [vmem:[#allocation5 + $0x144] ss:$16 sps:$4 sm:$0xff]   ;;  %v3484_v58 = vld [vmem:[#allocation5 + $0x140] ss:$16 sps:$4 sm:$0xff]   ;;  %v3530_v28 = vld [vmem:[#allocation5 + $0x88] ss:$16 sps:$4 sm:$0xff]  }
  0x59   :  { %1377 = vmatprep.subr.bf16.mxu1 %v3446_v29  ;;  %1354 = vmatprep.mubr.bf16.mxu0 %v4122_v47  ;;  %v3482_v57 = vld [vmem:[#allocation5 + $0x344] ss:$16 sps:$4 sm:$0xff]   ;;  %v3485_v59 = vld [vmem:[#allocation5 + $0x340] ss:$16 sps:$4 sm:$0xff]   ;;  %v3554_v46 = vld [vmem:[#allocation5 + $0x8] ss:$16 sps:$4 sm:$0xff]  }
  0x5a   :  { %v3486_v60 = vld [vmem:[#allocation5 + $0x124] ss:$16 sps:$4 sm:$0xff]   ;;  %v3490_v62 = vld [vmem:[#allocation5 + $0x120] ss:$16 sps:$4 sm:$0xff]  }
  0x5b   :  { %1337 = vmatpush1.bf16.msra.mxu0 %v3448_v30  ;;  %v3488_v61 = vld [vmem:[#allocation5 + $0x324] ss:$16 sps:$4 sm:$0xff]   ;;  %v3491_v63 = vld [vmem:[#allocation5 + $0x320] ss:$16 sps:$4 sm:$0xff]   ;;  %v3538_v30 = vld [vmem:[#allocation5 + $0x6c] ss:$16 sps:$4 sm:$0xff]  }
  0x5c   :  { %1378 = vmatpush1.bf16.msra.mxu1 %v3449_v31  ;;  %1338 = vmatprep.subr.bf16.mxu0 %v3450_v32  ;;  %v3492_v0 = vld [vmem:[#allocation5 + $0x104] ss:$16 sps:$4 sm:$0xff]   ;;  %v3496_v2 = vld [vmem:[#allocation5 + $0x100] ss:$16 sps:$4 sm:$0xff]  }
  0x5d   :  { %1379 = vmatprep.subr.bf16.mxu1 %v3452_v33  ;;  %v3494_v1 = vld [vmem:[#allocation5 + $0x304] ss:$16 sps:$4 sm:$0xff]   ;;  %v3497_v3 = vld [vmem:[#allocation5 + $0x300] ss:$16 sps:$4 sm:$0xff]  }
  0x5e   :  { %v3504_v4 = vld [vmem:[#allocation5 + $0x4e4] ss:$16 sps:$4 sm:$0xff]   ;;  %v3502_v8 = vld [vmem:[#allocation5 + $0x4e0] ss:$16 sps:$4 sm:$0xff]  }
  0x5f   :  { %1339 = vmatpush2.bf16.msra.mxu0 %v3454_v34  ;;  %v3507_v5 = vld [vmem:[#allocation5 + $0x604] ss:$16 sps:$4 sm:$0xff]   ;;  %v3505_v9 = vld [vmem:[#allocation5 + $0x600] ss:$16 sps:$4 sm:$0xff]   ;;  %v3536_v34 = vld [vmem:[#allocation5 + $0x68] ss:$16 sps:$4 sm:$0xff]  }
  0x60   :  { %1380 = vmatpush2.bf16.msra.mxu1 %v3455_v35  ;;  %1340 = vmatprep.subr.bf16.mxu0 %v3456_v36  ;;  %v3510_v10 = vld [vmem:[#allocation5 + $0x4c4] ss:$16 sps:$4 sm:$0xff]   ;;  %v3508_v12 = vld [vmem:[#allocation5 + $0x4c0] ss:$16 sps:$4 sm:$0xff]   ;;  %v3544_v36 = vld [vmem:[#allocation5 + $0x4c] ss:$16 sps:$4 sm:$0xff]  }
  0x61   :  { %1381 = vmatprep.subr.bf16.mxu1 %v3458_v37  ;;  %v3516_v14 = vld [vmem:[#allocation5 + $0x4a4] ss:$16 sps:$4 sm:$0xff]   ;;  %v3514_v16 = vld [vmem:[#allocation5 + $0x4a0] ss:$16 sps:$4 sm:$0xff]  }
  0x62   :  { %v3523_v19 = vld [vmem:[#allocation5 + $0x484] ss:$16 sps:$4 sm:$0xff]   ;;  %v3521_v21 = vld [vmem:[#allocation5 + $0x480] ss:$16 sps:$4 sm:$0xff]  }
  0x63   :  { %1341 = vmatpush2.bf16.msra.mxu0 %v3460_v38  ;;  %v3529_v23 = vld [vmem:[#allocation5 + $0x464] ss:$16 sps:$4 sm:$0xff]   ;;  %v3527_v25 = vld [vmem:[#allocation5 + $0x460] ss:$16 sps:$4 sm:$0xff]   ;;  %v3542_v38 = vld [vmem:[#allocation5 + $0x48] ss:$16 sps:$4 sm:$0xff]  }
  0x64   :  { %1382 = vmatpush2.bf16.msra.mxu1 %v3461_v39  ;;  %1342 = vmatprep.subr.bf16.mxu0 %v3462_v40  ;;  %v3535_v27 = vld [vmem:[#allocation5 + $0x444] ss:$16 sps:$4 sm:$0xff]   ;;  %v3533_v29 = vld [vmem:[#allocation5 + $0x440] ss:$16 sps:$4 sm:$0xff]   ;;  %v3550_v40 = vld [vmem:[#allocation5 + $0x2c] ss:$16 sps:$4 sm:$0xff]  }
  0x65   :  { %1383 = vmatprep.subr.bf16.mxu1 %v3464_v41  ;;  %v3541_v31 = vld [vmem:[#allocation5 + $0x424] ss:$16 sps:$4 sm:$0xff]   ;;  %v3539_v35 = vld [vmem:[#allocation5 + $0x420] ss:$16 sps:$4 sm:$0xff]  }
  0x66   :  { %v4137_v32 = vld [vmem:[#allocation2 + $0x10] sm:$0xff]  ;;  %v3545_v39 = vld [vmem:[#allocation5 + $0x400] ss:$16 sps:$4 sm:$0xff]  }
  0x67   :  { %1343 = vmatpush2.bf16.msra.mxu0 %v3466_v42  ;;  %v4141_v33 = vcombine.high %v4137_v32, %v4137_v32  ;;  %v3547_v37 = vld [vmem:[#allocation5 + $0x404] ss:$16 sps:$4 sm:$0xff]   ;;  %v3548_v42 = vld [vmem:[#allocation5 + $0x28] ss:$16 sps:$4 sm:$0xff]  }
  0x68   :  { %1384 = vmatpush2.bf16.msra.mxu1 %v3467_v43  ;;  %1344 = vmatprep.subr.bf16.mxu0 %v3468_v44  ;;  %v3553_v41 = vld [vmem:[#allocation5 + $0x5e4] ss:$16 sps:$4 sm:$0xff]   ;;  %v3551_v43 = vld [vmem:[#allocation5 + $0x5e0] ss:$16 sps:$4 sm:$0xff]   ;;  %v3556_v44 = vld [vmem:[#allocation5 + $0xc] ss:$16 sps:$4 sm:$0xff]  }
  0x69   :  { %1385 = vmatprep.subr.bf16.mxu1 %v3470_v45  ;;  %v3559_v45 = vld [vmem:[#allocation5 + $0x5c4] ss:$16 sps:$4 sm:$0xff]  }
  0x6b   :  { %1345 = vmatpush2.bf16.msra.mxu0 %v3472_v49  ;;  %v3565_v49 = vld [vmem:[#allocation5 + $0x5a4] ss:$16 sps:$4 sm:$0xff]  }
  0x6c   :  { %1386 = vmatpush2.bf16.msra.mxu1 %v3473_v50  ;;  %1346 = vmatprep.subr.bf16.mxu0 %v3474_v52  ;;  %v3560_v50 = vld [vmem:[#allocation5 + $0x1e8] ss:$16 sps:$4 sm:$0xff]   ;;  %v3563_v52 = vld [vmem:[#allocation5 + $0x5a0] ss:$16 sps:$4 sm:$0xff]  }
  0x6d   :  { %1387 = vmatprep.subr.bf16.mxu1 %v3476_v53  ;;  %v3568_v53 = vld [vmem:[#allocation5 + $0x1cc] ss:$16 sps:$4 sm:$0xff]  }
  0x6f   :  { %1347 = vmatpush2.bf16.msra.mxu0 %v3478_v54  ;;  %v3571_v54 = vld [vmem:[#allocation5 + $0x584] ss:$16 sps:$4 sm:$0xff]  }
  0x70   :  { %1388 = vmatpush2.bf16.msra.mxu1 %v3479_v55  ;;  %1348 = vmatprep.subr.bf16.mxu0 %v3480_v56  ;;  %v3566_v55 = vld [vmem:[#allocation5 + $0x1c8] ss:$16 sps:$4 sm:$0xff]   ;;  %v3569_v56 = vld [vmem:[#allocation5 + $0x580] ss:$16 sps:$4 sm:$0xff]  }
  0x71   :  { %1389 = vmatprep.subr.bf16.mxu1 %v3482_v57  ;;  %v3574_v57 = vld [vmem:[#allocation5 + $0x1ac] ss:$16 sps:$4 sm:$0xff]  }
  0x73   :  { %1349 = vmatpush2.bf16.msra.mxu0 %v3484_v58  ;;  %v3577_v58 = vld [vmem:[#allocation5 + $0x564] ss:$16 sps:$4 sm:$0xff]  }
  0x74   :  { %1390 = vmatpush2.bf16.msra.mxu1 %v3485_v59  ;;  %1350 = vmatprep.subr.bf16.mxu0 %v3486_v60  ;;  %v3572_v59 = vld [vmem:[#allocation5 + $0x1a8] ss:$16 sps:$4 sm:$0xff]   ;;  %v3575_v60 = vld [vmem:[#allocation5 + $0x560] ss:$16 sps:$4 sm:$0xff]  }
  0x75   :  { %1391 = vmatprep.subr.bf16.mxu1 %v3488_v61  ;;  %v3580_v61 = vld [vmem:[#allocation5 + $0x18c] ss:$16 sps:$4 sm:$0xff]  }
  0x77   :  { %1351 = vmatpush2.bf16.msra.mxu0 %v3490_v62  ;;  %v3583_v62 = vld [vmem:[#allocation5 + $0x544] ss:$16 sps:$4 sm:$0xff]  }
  0x78   :  { %1392 = vmatpush2.bf16.msra.mxu1 %v3491_v63  ;;  %1352 = vmatprep.subr.bf16.mxu0 %v3492_v0  ;;  %v3578_v63 = vld [vmem:[#allocation5 + $0x188] ss:$16 sps:$4 sm:$0xff]   ;;  %v3581_v0 = vld [vmem:[#allocation5 + $0x540] ss:$16 sps:$4 sm:$0xff]  }
  0x79   :  { %1393 = vmatprep.subr.bf16.mxu1 %v3494_v1  ;;  %v3586_v1 = vld [vmem:[#allocation5 + $0x16c] ss:$16 sps:$4 sm:$0xff]  }
  0x7b   :  { %1353 = vmatpush2.bf16.msra.mxu0 %v3496_v2  ;;  %v3589_v2 = vld [vmem:[#allocation5 + $0x524] ss:$16 sps:$4 sm:$0xff]  }
  0x7c   :  { %1394 = vmatpush2.bf16.msra.mxu1 %v3497_v3  ;;  %1404 = vmatprep.subr.bf16.mxu0 %v3504_v4  ;;  %v3584_v3 = vld [vmem:[#allocation5 + $0x168] ss:$16 sps:$4 sm:$0xff]   ;;  %v3587_v4 = vld [vmem:[#allocation5 + $0x520] ss:$16 sps:$4 sm:$0xff]  }
  0x7d   :  { %1459 = vmatprep.subr.bf16.mxu1 %v3507_v5  ;;  %v3592_v5 = vld [vmem:[#allocation5 + $0x14c] ss:$16 sps:$4 sm:$0xff]  }
  0x7e   :  { %1355 = vmatmul.mubr.bf16.vlgmr.msra.gmra.mxu0 %v4128_v6 }
  0x7f   :  { %1396 = vmatmul.mubr.bf16.vlgmr.msra.gmra.mxu1 %v4130_v7  ;;  %1405 = vmatpush1.bf16.msra.mxu0 %v3502_v8  ;;  %v3595_v8 = vld [vmem:[#allocation5 + $0x504] ss:$16 sps:$4 sm:$0xff]  }
  0x80   :  { %1460 = vmatpush1.bf16.msra.mxu1 %v3505_v9  ;;  %1406 = vmatprep.subr.bf16.mxu0 %v3510_v10  ;;  %v3590_v9 = vld [vmem:[#allocation5 + $0x148] ss:$16 sps:$4 sm:$0xff]   ;;  %v3593_v10 = vld [vmem:[#allocation5 + $0x500] ss:$16 sps:$4 sm:$0xff]  }
  0x81   :  { %1477 = vmatprep.mubr.bf16.mxu1 %v4065_v13  ;;  %1486 = vmatprep.subr.bf16.mxu1 %v3513_v11  ;;  %v3600_v11 = vld [vmem:[#allocation5 + $0x12c] ss:$16 sps:$4 sm:$0xff]  }
  0x82   :  { %1436 = vmatprep.mubr.bf16.mxu0 %v4141_v33 }
  0x83   :  { %1407 = vmatpush1.bf16.msra.mxu0 %v3508_v12  ;;  %v3603_v12 = vld [vmem:[#allocation5 + $0x2ec] ss:$16 sps:$4 sm:$0xff]  }
  0x84   :  { %1408 = vmatprep.subr.bf16.mxu0 %v3516_v14  ;;  %v4146_v14 = vcombine.low %v4137_v32, %v4137_v32  ;;  %v3625_v32 = vld [vmem:[#allocation5 + $0x268] ss:$16 sps:$4 sm:$0xff]  }
  0x87   :  { %3184 = vmatmul.mubr.msk.bf16.vlgmr.msra.gmra.mxu1 %vm1318_vm0, %v3517_v17  ;;  %1409 = vmatpush1.bf16.msra.mxu0 %v3514_v16  ;;  %v3601_v16 = vld [vmem:[#allocation5 + $0x2e8] ss:$16 sps:$4 sm:$0xff]   ;;  %v3606_v17 = vld [vmem:[#allocation5 + $0x10c] ss:$16 sps:$4 sm:$0xff]  }
  0x88   :  { %1487 = vmatpush1.bf16.msra.mxu1 %v3511_v15  ;;  %1410 = vmatprep.subr.bf16.mxu0 %v3523_v19  ;;  %v3598_v15 = vld [vmem:[#allocation5 + $0x128] ss:$16 sps:$4 sm:$0xff]  }
  0x89   :  { %1488 = vmatprep.subr.bf16.mxu1 %v3520_v18  ;;  %1518 = vmatprep.mubr.bf16.mxu1 %v4122_v47  ;;  %v3557_v47 = vld [vmem:[#allocation5 + $0x5c0] ss:$16 sps:$4 sm:$0xff]   ;;  %v3609_v18 = vld [vmem:[#allocation5 + $0x2cc] ss:$16 sps:$4 sm:$0xff]   ;;  %v3604_v19 = vld [vmem:[#allocation5 + $0x108] ss:$16 sps:$4 sm:$0xff]  }
  0x8b   :  { %1411 = vmatpush1.bf16.msra.mxu0 %v3521_v21  ;;  %v3612_v21 = vld [vmem:[#allocation5 + $0x4ec] ss:$16 sps:$4 sm:$0xff]  }
  0x8c   :  { %1489 = vmatpush1.bf16.msra.mxu1 %v3518_v20  ;;  %1412 = vmatprep.subr.bf16.mxu0 %v3529_v23  ;;  %v3607_v20 = vld [vmem:[#allocation5 + $0x2c8] ss:$16 sps:$4 sm:$0xff]  }
  0x8d   :  { %1490 = vmatprep.subr.bf16.mxu1 %v3526_v22  ;;  %v3615_v22 = vld [vmem:[#allocation5 + $0x2ac] ss:$16 sps:$4 sm:$0xff]   ;;  %v3610_v23 = vld [vmem:[#allocation5 + $0x4e8] ss:$16 sps:$4 sm:$0xff]  }
  0x8f   :  { %1413 = vmatpush1.bf16.msra.mxu0 %v3527_v25  ;;  %v3618_v25 = vld [vmem:[#allocation5 + $0x4cc] ss:$16 sps:$4 sm:$0xff]  }
  0x90   :  { %1491 = vmatpush1.bf16.msra.mxu1 %v3524_v24  ;;  %1414 = vmatprep.subr.bf16.mxu0 %v3535_v27  ;;  %v3613_v24 = vld [vmem:[#allocation5 + $0x2a8] ss:$16 sps:$4 sm:$0xff]  }
  0x91   :  { %1492 = vmatprep.subr.bf16.mxu1 %v3532_v26  ;;  %v3621_v26 = vld [vmem:[#allocation5 + $0x28c] ss:$16 sps:$4 sm:$0xff]   ;;  %v3616_v27 = vld [vmem:[#allocation5 + $0x4c8] ss:$16 sps:$4 sm:$0xff]  }
  0x93   :  { %1415 = vmatpush1.bf16.msra.mxu0 %v3533_v29  ;;  %v3624_v29 = vld [vmem:[#allocation5 + $0x4ac] ss:$16 sps:$4 sm:$0xff]  }
  0x94   :  { %1493 = vmatpush1.bf16.msra.mxu1 %v3530_v28  ;;  %1416 = vmatprep.subr.bf16.mxu0 %v3541_v31  ;;  %v3619_v28 = vld [vmem:[#allocation5 + $0x288] ss:$16 sps:$4 sm:$0xff]  }
  0x95   :  { %1494 = vmatprep.subr.bf16.mxu1 %v3538_v30  ;;  %v3627_v30 = vld [vmem:[#allocation5 + $0x26c] ss:$16 sps:$4 sm:$0xff]   ;;  %v3622_v31 = vld [vmem:[#allocation5 + $0x4a8] ss:$16 sps:$4 sm:$0xff]  }
  0x97   :  { %1417 = vmatpush1.bf16.msra.mxu0 %v3539_v35  ;;  %v3628_v35 = vld [vmem:[#allocation5 + $0x488] ss:$16 sps:$4 sm:$0xff]  }
  0x98   :  { %1495 = vmatpush1.bf16.msra.mxu1 %v3536_v34  ;;  %1418 = vmatprep.subr.bf16.mxu0 %v3547_v37  ;;  %v3633_v34 = vld [vmem:[#allocation5 + $0x24c] ss:$16 sps:$4 sm:$0xff]  }
  0x99   :  { %1496 = vmatprep.subr.bf16.mxu1 %v3544_v36  ;;  %v3636_v36 = vld [vmem:[#allocation5 + $0x46c] ss:$16 sps:$4 sm:$0xff]  }
  0x9a   :  { %v3639_v37 = vld [vmem:[#allocation5 + $0x22c] ss:$16 sps:$4 sm:$0xff]  }
  0x9b   :  { %1419 = vmatpush1.bf16.msra.mxu0 %v3545_v39  ;;  %v3637_v39 = vld [vmem:[#allocation5 + $0x228] ss:$16 sps:$4 sm:$0xff]  }
  0x9c   :  { %1497 = vmatpush1.bf16.msra.mxu1 %v3542_v38  ;;  %1420 = vmatprep.subr.bf16.mxu0 %v3553_v41  ;;  %v3634_v38 = vld [vmem:[#allocation5 + $0x468] ss:$16 sps:$4 sm:$0xff]  }
  0x9d   :  { %1498 = vmatprep.subr.bf16.mxu1 %v3550_v40  ;;  %v3645_v40 = vld [vmem:[#allocation5 + $0x20c] ss:$16 sps:$4 sm:$0xff]   ;;  %v3640_v41 = vld [vmem:[#allocation5 + $0x448] ss:$16 sps:$4 sm:$0xff]  }
  0x9f   :  { %1421 = vmatpush2.bf16.msra.mxu0 %v3551_v43  ;;  %v3648_v43 = vld [vmem:[#allocation5 + $0x42c] ss:$16 sps:$4 sm:$0xff]  }
  0xa0   :  { %1499 = vmatpush1.bf16.msra.mxu1 %v3548_v42  ;;  %1422 = vmatprep.subr.bf16.mxu0 %v3559_v45  ;;  %v3643_v42 = vld [vmem:[#allocation5 + $0x208] ss:$16 sps:$4 sm:$0xff]  }
  0xa1   :  { %1500 = vmatprep.subr.bf16.mxu1 %v3556_v44  ;;  %v3651_v44 = vld [vmem:[#allocation5 + $0x3ec] ss:$16 sps:$4 sm:$0xff]   ;;  %v3646_v45 = vld [vmem:[#allocation5 + $0x428] ss:$16 sps:$4 sm:$0xff]  }
  0xa3   :  { %1423 = vmatpush2.bf16.msra.mxu0 %v3557_v47  ;;  %v3654_v47 = vld [vmem:[#allocation5 + $0x40c] ss:$16 sps:$4 sm:$0xff]  }
  0xa4   :  { %1501 = vmatpush1.bf16.msra.mxu1 %v3554_v46  ;;  %1424 = vmatprep.subr.bf16.mxu0 %v3565_v49  ;;  %v3649_v46 = vld [vmem:[#allocation5 + $0x3e8] ss:$16 sps:$4 sm:$0xff]  }
  0xa5   :  { %1502 = vmatprep.subr.bf16.mxu1 %v3562_v48  ;;  %v3657_v48 = vld [vmem:[#allocation5 + $0x3cc] ss:$16 sps:$4 sm:$0xff]   ;;  %v3652_v49 = vld [vmem:[#allocation5 + $0x408] ss:$16 sps:$4 sm:$0xff]  }
  0xa7   :  { %1425 = vmatpush2.bf16.msra.mxu0 %v3563_v52  ;;  %v3660_v52 = vld [vmem:[#allocation5 + $0x5ec] ss:$16 sps:$4 sm:$0xff]  }
  0xa8   :  { %1503 = vmatpush2.bf16.msra.mxu1 %v3560_v50  ;;  %1426 = vmatprep.subr.bf16.mxu0 %v3571_v54  ;;  %v3655_v50 = vld [vmem:[#allocation5 + $0x3c8] ss:$16 sps:$4 sm:$0xff]  }
  0xa9   :  { %1504 = vmatprep.subr.bf16.mxu1 %v3568_v53  ;;  %v3663_v53 = vld [vmem:[#allocation5 + $0x3ac] ss:$16 sps:$4 sm:$0xff]   ;;  %v3658_v54 = vld [vmem:[#allocation5 + $0x5e8] ss:$16 sps:$4 sm:$0xff]  }
  0xab   :  { %1427 = vmatpush2.bf16.msra.mxu0 %v3569_v56  ;;  %v3666_v56 = vld [vmem:[#allocation5 + $0x5cc] ss:$16 sps:$4 sm:$0xff]  }
  0xac   :  { %1505 = vmatpush2.bf16.msra.mxu1 %v3566_v55  ;;  %1428 = vmatprep.subr.bf16.mxu0 %v3577_v58  ;;  %v3661_v55 = vld [vmem:[#allocation5 + $0x3a8] ss:$16 sps:$4 sm:$0xff]  }
  0xad   :  { %1506 = vmatprep.subr.bf16.mxu1 %v3574_v57  ;;  %v3669_v57 = vld [vmem:[#allocation5 + $0x38c] ss:$16 sps:$4 sm:$0xff]   ;;  %v3664_v58 = vld [vmem:[#allocation5 + $0x5c8] ss:$16 sps:$4 sm:$0xff]  }
  0xaf   :  { %1429 = vmatpush2.bf16.msra.mxu0 %v3575_v60  ;;  %v3672_v60 = vld [vmem:[#allocation5 + $0x5ac] ss:$16 sps:$4 sm:$0xff]  }
  0xb0   :  { %1507 = vmatpush2.bf16.msra.mxu1 %v3572_v59  ;;  %1430 = vmatprep.subr.bf16.mxu0 %v3583_v62  ;;  %v3667_v59 = vld [vmem:[#allocation5 + $0x388] ss:$16 sps:$4 sm:$0xff]  }
  0xb1   :  { %1508 = vmatprep.subr.bf16.mxu1 %v3580_v61  ;;  %v3675_v61 = vld [vmem:[#allocation5 + $0x36c] ss:$16 sps:$4 sm:$0xff]   ;;  %v3670_v62 = vld [vmem:[#allocation5 + $0x5a8] ss:$16 sps:$4 sm:$0xff]  }
  0xb3   :  { %1431 = vmatpush2.bf16.msra.mxu0 %v3581_v0  ;;  %v3678_v0 = vld [vmem:[#allocation5 + $0x58c] ss:$16 sps:$4 sm:$0xff]  }
  0xb4   :  { %1509 = vmatpush2.bf16.msra.mxu1 %v3578_v63  ;;  %1432 = vmatprep.subr.bf16.mxu0 %v3589_v2  ;;  %v3673_v63 = vld [vmem:[#allocation5 + $0x368] ss:$16 sps:$4 sm:$0xff]  }
  0xb5   :  { %1510 = vmatprep.subr.bf16.mxu1 %v3586_v1  ;;  %v3681_v1 = vld [vmem:[#allocation5 + $0x34c] ss:$16 sps:$4 sm:$0xff]   ;;  %v3676_v2 = vld [vmem:[#allocation5 + $0x588] ss:$16 sps:$4 sm:$0xff]  }
  0xb7   :  { %1433 = vmatpush2.bf16.msra.mxu0 %v3587_v4  ;;  %v3684_v4 = vld [vmem:[#allocation5 + $0x56c] ss:$16 sps:$4 sm:$0xff]  }
  0xb8   :  { %1511 = vmatpush2.bf16.msra.mxu1 %v3584_v3  ;;  %1434 = vmatprep.subr.bf16.mxu0 %v3595_v8  ;;  %v3679_v3 = vld [vmem:[#allocation5 + $0x348] ss:$16 sps:$4 sm:$0xff]  }
  0xb9   :  { %1512 = vmatprep.subr.bf16.mxu1 %v3592_v5  ;;  %v3687_v5 = vld [vmem:[#allocation5 + $0x32c] ss:$16 sps:$4 sm:$0xff]   ;;  %v3682_v8 = vld [vmem:[#allocation5 + $0x568] ss:$16 sps:$4 sm:$0xff]  }
  0xbb   :  { %1435 = vmatpush2.bf16.msra.mxu0 %v3593_v10  ;;  %v3690_v10 = vld [vmem:[#allocation5 + $0x54c] ss:$16 sps:$4 sm:$0xff]  }
  0xbc   :  { %1513 = vmatpush2.bf16.msra.mxu1 %v3590_v9  ;;  %1527 = vmatprep.subr.bf16.mxu0 %v3603_v12  ;;  %v3685_v9 = vld [vmem:[#allocation5 + $0x328] ss:$16 sps:$4 sm:$0xff]  }
  0xbd   :  { %1514 = vmatprep.subr.bf16.mxu1 %v3600_v11  ;;  %v3693_v11 = vld [vmem:[#allocation5 + $0x30c] ss:$16 sps:$4 sm:$0xff]   ;;  %v3688_v12 = vld [vmem:[#allocation5 + $0x548] ss:$16 sps:$4 sm:$0xff]  }
  0xbe   :  { %1437 = vmatmul.mubr.bf16.vlgmr.msra.gmra.mxu0 %v4146_v14 }
  0xbf   :  { %1528 = vmatpush1.bf16.msra.mxu0 %v3601_v16  ;;  %1559 = vmatprep.mubr.bf16.mxu0 %v4124_v51  ;;  %v3630_v51 = vld [vmem:[#allocation5 + $0x48c] ss:$16 sps:$4 sm:$0xff]  }
  0xc0   :  { %1515 = vmatpush2.bf16.msra.mxu1 %v3598_v15  ;;  %1529 = vmatprep.subr.bf16.mxu0 %v3609_v18  ;;  %v3691_v15 = vld [vmem:[#allocation5 + $0x308] ss:$16 sps:$4 sm:$0xff]   ;;  %v3696_v16 = vld [vmem:[#allocation5 + $0x52c] ss:$16 sps:$4 sm:$0xff]  }
  0xc1   :  { %1516 = vmatprep.subr.bf16.mxu1 %v3606_v17  ;;  %v3699_v17 = vld [vmem:[#allocation5 + $0x60c] ss:$16 sps:$4 sm:$0xff]   ;;  %v3694_v18 = vld [vmem:[#allocation5 + $0x528] ss:$16 sps:$4 sm:$0xff]  }
  0xc3   :  { %1530 = vmatpush1.bf16.msra.mxu0 %v3607_v20  ;;  %v3702_v20 = vld [vmem:[#allocation5 + $0x50c] ss:$16 sps:$4 sm:$0xff]  }
  0xc4   :  { %1517 = vmatpush2.bf16.msra.mxu1 %v3604_v19  ;;  %1531 = vmatprep.subr.bf16.mxu0 %v3615_v22  ;;  %v3697_v19 = vld [vmem:[#allocation5 + $0x608] ss:$16 sps:$4 sm:$0xff]  }
  0xc5   :  { %1568 = vmatprep.subr.bf16.mxu1 %v3612_v21  ;;  %v3705_v21 = vld [vmem:[#allocation8 + $0xe4] ss:$16 sps:$4 sm:$0xff]  }
  0xc6   :  { %v3700_v22 = vld [vmem:[#allocation5 + $0x508] ss:$16 sps:$4 sm:$0xff]  }
  0xc7   :  { %1519 = vmatmul.mubr.bf16.vlgmr.msra.gmra.mxu1 %v4128_v6  ;;  %1532 = vmatpush1.bf16.msra.mxu0 %v3613_v24  ;;  %v3631_v6 = vld [vmem:[#allocation5 + $0x248] ss:$16 sps:$4 sm:$0xff]  }
  0xc8   :  { %1569 = vmatpush1.bf16.msra.mxu1 %v3610_v23  ;;  %1533 = vmatprep.subr.bf16.mxu0 %v3621_v26  ;;  %v3703_v23 = vld [vmem:[#allocation8 + $0xe0] ss:$16 sps:$4 sm:$0xff]   ;;  %v3708_v24 = vld [vmem:[#allocation8 + $0xc4] ss:$16 sps:$4 sm:$0xff]   ;;  %v3927_v26 = vld [vmem:[#allocation2 + $0x18] ss:$0 sps:$4 sm:$0xff]  }
  0xc9   :  { %1570 = vmatprep.subr.bf16.mxu1 %v3618_v25  ;;  %1600 = vmatprep.mubr.bf16.mxu1 %v4141_v33  ;;  %v3642_v33 = vld [vmem:[#allocation5 + $0x44c] ss:$16 sps:$4 sm:$0xff]   ;;  %v3706_v25 = vld [vmem:[#allocation8 + $0xc0] ss:$16 sps:$4 sm:$0xff]  }
  0xcb   :  { %1534 = vmatpush1.bf16.msra.mxu0 %v3619_v28  ;;  %v3714_v28 = vld [vmem:[#allocation8 + $0x84] ss:$16 sps:$4 sm:$0xff]  }
  0xcc   :  { %1571 = vmatpush1.bf16.msra.mxu1 %v3616_v27  ;;  %1535 = vmatprep.subr.bf16.mxu0 %v3627_v30  ;;  %v3711_v27 = vld [vmem:[#allocation8 + $0xa4] ss:$16 sps:$4 sm:$0xff]  }
  0xcd   :  { %1572 = vmatprep.subr.bf16.mxu1 %v3624_v29  ;;  %v3712_v29 = vld [vmem:[#allocation8 + $0x80] ss:$16 sps:$4 sm:$0xff]   ;;  %v3759_v30 = vld [vmem:[#allocation8 + $0x2e4] ss:$16 sps:$4 sm:$0xff]  }
  0xcf   :  { %1536 = vmatpush1.bf16.msra.mxu0 %v3625_v32  ;;  %v3763_v32 = vld [vmem:[#allocation8 + $0x2c0] ss:$16 sps:$4 sm:$0xff]  }
  0xd0   :  { %1573 = vmatpush1.bf16.msra.mxu1 %v3622_v31  ;;  %1537 = vmatprep.subr.bf16.mxu0 %v3633_v34  ;;  %v3717_v31 = vld [vmem:[#allocation8 + $0x64] ss:$16 sps:$4 sm:$0xff]  }
  0xd1   :  { %1574 = vmatprep.subr.bf16.mxu1 %v3630_v51  ;;  %v3765_v51 = vld [vmem:[#allocation8 + $0x2c4] ss:$16 sps:$4 sm:$0xff]  }
  0xd2   :  { %v3720_v34 = vld [vmem:[#allocation8 + $0x44] ss:$16 sps:$4 sm:$0xff]  }
  0xd3   :  { %1538 = vmatpush1.bf16.msra.mxu0 %v3631_v6  ;;  %v3769_v6 = vld [vmem:[#allocation8 + $0x2a0] ss:$16 sps:$4 sm:$0xff]  }
  0xd4   :  { %1575 = vmatpush1.bf16.msra.mxu1 %v3628_v35  ;;  %1539 = vmatprep.subr.bf16.mxu0 %v3639_v37  ;;  %v3718_v35 = vld [vmem:[#allocation8 + $0x40] ss:$16 sps:$4 sm:$0xff]   ;;  %v3723_v37 = vld [vmem:[#allocation8 + $0x24] ss:$16 sps:$4 sm:$0xff]  }
  0xd5   :  { %1576 = vmatprep.subr.bf16.mxu1 %v3636_v36  ;;  %v3771_v36 = vld [vmem:[#allocation8 + $0x2a4] ss:$16 sps:$4 sm:$0xff]  }
  0xd7   :  { %1540 = vmatpush1.bf16.msra.mxu0 %v3637_v39  ;;  %v3775_v39 = vld [vmem:[#allocation8 + $0x280] ss:$16 sps:$4 sm:$0xff]  }
  0xd8   :  { %1577 = vmatpush1.bf16.msra.mxu1 %v3634_v38  ;;  %1541 = vmatprep.subr.bf16.mxu0 %v3645_v40  ;;  %v3721_v38 = vld [vmem:[#allocation8 + $0x20] ss:$16 sps:$4 sm:$0xff]   ;;  %v3726_v40 = vld [vmem:[#allocation8 + $0x4] ss:$16 sps:$4 sm:$0xff]  }
  0xd9   :  { %1578 = vmatprep.subr.bf16.mxu1 %v3642_v33  ;;  %v3777_v33 = vld [vmem:[#allocation8 + $0x284] ss:$16 sps:$4 sm:$0xff]  }
  0xdb   :  { %1542 = vmatpush1.bf16.msra.mxu0 %v3643_v42  ;;  %v3781_v42 = vld [vmem:[#allocation8 + $0x260] ss:$16 sps:$4 sm:$0xff]  }
  0xdc   :  { %1579 = vmatpush1.bf16.msra.mxu1 %v3640_v41  ;;  %1543 = vmatprep.subr.bf16.mxu0 %v3651_v44  ;;  %v3724_v41 = vld [vmem:[#allocation8] ss:$16 sps:$4 sm:$0xff]   ;;  %v3729_v44 = vld [vmem:[#allocation8 + $0x1e4] ss:$16 sps:$4 sm:$0xff]  }
  0xdd   :  { %1580 = vmatprep.subr.bf16.mxu1 %v3648_v43  ;;  %v3783_v43 = vld [vmem:[#allocation8 + $0x264] ss:$16 sps:$4 sm:$0xff]  }
  0xdf   :  { %1544 = vmatpush2.bf16.msra.mxu0 %v3649_v46  ;;  %v3787_v46 = vld [vmem:[#allocation8 + $0x240] ss:$16 sps:$4 sm:$0xff]  }
  0xe0   :  { %1581 = vmatpush1.bf16.msra.mxu1 %v3646_v45  ;;  %1545 = vmatprep.subr.bf16.mxu0 %v3657_v48  ;;  %v3727_v45 = vld [vmem:[#allocation8 + $0x1e0] ss:$16 sps:$4 sm:$0xff]   ;;  %v3732_v48 = vld [vmem:[#allocation8 + $0x1c4] ss:$16 sps:$4 sm:$0xff]  }
  0xe1   :  { %1582 = vmatprep.subr.bf16.mxu1 %v3654_v47  ;;  %v3789_v47 = vld [vmem:[#allocation8 + $0x244] ss:$16 sps:$4 sm:$0xff]  }
  0xe3   :  { %1546 = vmatpush2.bf16.msra.mxu0 %v3655_v50  ;;  %v3793_v50 = vld [vmem:[#allocation8 + $0x220] ss:$16 sps:$4 sm:$0xff]  }
  0xe4   :  { %1583 = vmatpush1.bf16.msra.mxu1 %v3652_v49  ;;  %1547 = vmatprep.subr.bf16.mxu0 %v3663_v53  ;;  %v3730_v49 = vld [vmem:[#allocation8 + $0x1c0] ss:$16 sps:$4 sm:$0xff]   ;;  %v3735_v53 = vld [vmem:[#allocation8 + $0x1a4] ss:$16 sps:$4 sm:$0xff]  }
  0xe5   :  { %1584 = vmatprep.subr.bf16.mxu1 %v3660_v52  ;;  %v3795_v52 = vld [vmem:[#allocation8 + $0x224] ss:$16 sps:$4 sm:$0xff]  }
  0xe7   :  { %1548 = vmatpush2.bf16.msra.mxu0 %v3661_v55  ;;  %v3799_v55 = vld [vmem:[#allocation8 + $0x200] ss:$16 sps:$4 sm:$0xff]  }
  0xe8   :  { %1585 = vmatpush2.bf16.msra.mxu1 %v3658_v54  ;;  %1549 = vmatprep.subr.bf16.mxu0 %v3669_v57  ;;  %v3733_v54 = vld [vmem:[#allocation8 + $0x1a0] ss:$16 sps:$4 sm:$0xff]   ;;  %v3738_v57 = vld [vmem:[#allocation8 + $0x184] ss:$16 sps:$4 sm:$0xff]  }
  0xe9   :  { %1586 = vmatprep.subr.bf16.mxu1 %v3666_v56  ;;  %v3801_v56 = vld [vmem:[#allocation8 + $0x204] ss:$16 sps:$4 sm:$0xff]  }
  0xeb   :  { %1550 = vmatpush2.bf16.msra.mxu0 %v3667_v59  ;;  %v3805_v59 = vld [vmem:[#allocation8 + $0x3e0] ss:$16 sps:$4 sm:$0xff]  }
  0xec   :  { %1587 = vmatpush2.bf16.msra.mxu1 %v3664_v58  ;;  %1551 = vmatprep.subr.bf16.mxu0 %v3675_v61  ;;  %v3736_v58 = vld [vmem:[#allocation8 + $0x180] ss:$16 sps:$4 sm:$0xff]   ;;  %v3741_v61 = vld [vmem:[#allocation8 + $0x164] ss:$16 sps:$4 sm:$0xff]  }
  0xed   :  { %1588 = vmatprep.subr.bf16.mxu1 %v3672_v60  ;;  %v3807_v60 = vld [vmem:[#allocation8 + $0x3e4] ss:$16 sps:$4 sm:$0xff]  }
  0xef   :  { %1552 = vmatpush2.bf16.msra.mxu0 %v3673_v63  ;;  %v3811_v63 = vld [vmem:[#allocation8 + $0x3c0] ss:$16 sps:$4 sm:$0xff]  }
  0xf0   :  { %1589 = vmatpush2.bf16.msra.mxu1 %v3670_v62  ;;  %1553 = vmatprep.subr.bf16.mxu0 %v3681_v1  ;;  %v3739_v62 = vld [vmem:[#allocation8 + $0x160] ss:$16 sps:$4 sm:$0xff]   ;;  %v3744_v1 = vld [vmem:[#allocation8 + $0x144] ss:$16 sps:$4 sm:$0xff]  }
  0xf1   :  { %1590 = vmatprep.subr.bf16.mxu1 %v3678_v0  ;;  %v3813_v0 = vld [vmem:[#allocation8 + $0x3c4] ss:$16 sps:$4 sm:$0xff]  }
  0xf3   :  { %1554 = vmatpush2.bf16.msra.mxu0 %v3679_v3  ;;  %v3817_v3 = vld [vmem:[#allocation8 + $0x3a0] ss:$16 sps:$4 sm:$0xff]  }
  0xf4   :  { %1591 = vmatpush2.bf16.msra.mxu1 %v3676_v2  ;;  %1555 = vmatprep.subr.bf16.mxu0 %v3687_v5  ;;  %v3742_v2 = vld [vmem:[#allocation8 + $0x140] ss:$16 sps:$4 sm:$0xff]   ;;  %v3747_v5 = vld [vmem:[#allocation8 + $0x124] ss:$16 sps:$4 sm:$0xff]  }
  0xf5   :  { %1592 = vmatprep.subr.bf16.mxu1 %v3684_v4  ;;  %v3819_v4 = vld [vmem:[#allocation8 + $0x3a4] ss:$16 sps:$4 sm:$0xff]  }
  0xf7   :  { %1556 = vmatpush2.bf16.msra.mxu0 %v3685_v9  ;;  %v3823_v9 = vld [vmem:[#allocation8 + $0x380] ss:$16 sps:$4 sm:$0xff]  }
  0xf8   :  { %1593 = vmatpush2.bf16.msra.mxu1 %v3682_v8  ;;  %1557 = vmatprep.subr.bf16.mxu0 %v3693_v11  ;;  %v3745_v8 = vld [vmem:[#allocation8 + $0x120] ss:$16 sps:$4 sm:$0xff]   ;;  %v3750_v11 = vld [vmem:[#allocation8 + $0x104] ss:$16 sps:$4 sm:$0xff]  }
  0xf9   :  { %1594 = vmatprep.subr.bf16.mxu1 %v3690_v10  ;;  %v3825_v10 = vld [vmem:[#allocation8 + $0x384] ss:$16 sps:$4 sm:$0xff]  }
  0xfb   :  { %1558 = vmatpush2.bf16.msra.mxu0 %v3691_v15 }
  0xfc   :  { %1595 = vmatpush2.bf16.msra.mxu1 %v3688_v12  ;;  %1623 = vmatprep.subr.bf16.mxu0 %v3699_v17  ;;  %v3831_v17 = vld [vmem:[#allocation8 + $0x364] ss:$16 sps:$4 sm:$0xff]  }
  0xfd   :  { %1596 = vmatprep.subr.bf16.mxu1 %v3696_v16  ;;  %v3748_v16 = vld [vmem:[#allocation8 + $0x100] ss:$16 sps:$4 sm:$0xff]  }
  0xfe   :  { %1560 = vmatmul.mubr.bf16.vlgmr.msra.gmra.mxu0 %v4130_v7  ;;  %v3709_v7 = vld [vmem:[#allocation8 + $0xa0] ss:$16 sps:$4 sm:$0xff]  }
  0xff   :  { %1624 = vmatpush1.bf16.msra.mxu0 %v3697_v19  ;;  %1641 = vmatprep.mubr.bf16.mxu0 %v4065_v13  ;;  %v3757_v13 = vld [vmem:[#allocation8 + $0x2e0] ss:$16 sps:$4 sm:$0xff]  }
 0x100   :  { %1597 = vmatpush2.bf16.msra.mxu1 %v3694_v18  ;;  %2448 = vmatprep.subr.bf16.mxu0 %v3705_v21  ;;  %v3829_v21 = vld [vmem:[#allocation8 + $0x360] ss:$16 sps:$4 sm:$0xff]  }
 0x101   :  { %1598 = vmatprep.subr.bf16.mxu1 %v3702_v20  ;;  %v3753_v20 = vld [vmem:[#allocation8 + $0xec] ss:$16 sps:$4 sm:$0xff]  }
 0x104   :  { %1599 = vmatpush2.bf16.msra.mxu1 %v3700_v22 }
 0x105   :  { %2489 = vmatprep.subr.bf16.mxu1 %v3759_v30 }
 0x106   :  { %3185 = vmatmul.mubr.msk.bf16.vlgmr.msra.gmra.mxu0 %vm1318_vm0, %v3927_v26 }
 0x107   :  { %1601 = vmatmul.mubr.bf16.vlgmr.msra.gmra.mxu1 %v4146_v14  ;;  %2449 = vmatpush1.bf16.msra.mxu0 %v3703_v23  ;;  %v3715_v14 = vld [vmem:[#allocation8 + $0x60] ss:$16 sps:$4 sm:$0xff]  }
 0x108   :  { %2450 = vmatprep.subr.bf16.mxu0 %v3708_v24  ;;  %2490 = vmatpush1.bf16.msra.mxu1 %v3757_v13  ;;  %v3837_v24 = vld [vmem:[#allocation8 + $0x344] ss:$16 sps:$4 sm:$0xff]   ;;  %v3841_v13 = vld [vmem:[#allocation8 + $0x320] ss:$16 sps:$4 sm:$0xff]  }
 0x109   :  { %2491 = vmatprep.subr.bf16.mxu1 %v3765_v51  ;;  %v3849_v51 = vld [vmem:[#allocation8 + $0x2ec] ss:$16 sps:$4 sm:$0xff]  }
 0x10b   :  { %2451 = vmatpush1.bf16.msra.mxu0 %v3706_v25 }
 0x10c   :  { %2452 = vmatprep.subr.bf16.mxu0 %v3711_v27  ;;  %2492 = vmatpush1.bf16.msra.mxu1 %v3763_v32  ;;  %v3835_v27 = vld [vmem:[#allocation8 + $0x340] ss:$16 sps:$4 sm:$0xff]  }
 0x10d   :  { %2493 = vmatprep.subr.bf16.mxu1 %v3771_v36  ;;  %v3844_v32 = vld [vmem:[#allocation8 + $0x300] ss:$16 sps:$4 sm:$0xff]   ;;  %v4159_v36 = vld [vmem:[#allocation7] sm:$0xf] }
 0x10f   :  { %2453 = vmatpush1.bf16.msra.mxu0 %v3709_v7 }
 0x110   :  { %2454 = vmatprep.subr.bf16.mxu0 %v3714_v28  ;;  %2494 = vmatpush1.bf16.msra.mxu1 %v3769_v6  ;;  %v3843_v28 = vld [vmem:[#allocation8 + $0x324] ss:$16 sps:$4 sm:$0xff]  }
 0x111   :  { %2495 = vmatprep.subr.bf16.mxu1 %v3777_v33 }
 0x113   :  { %2455 = vmatpush1.bf16.msra.mxu0 %v3712_v29 }
 0x114   :  { %2456 = vmatprep.subr.bf16.mxu0 %v3717_v31  ;;  %2496 = vmatpush1.bf16.msra.mxu1 %v3775_v39  ;;  %v3846_v31 = vld [vmem:[#allocation8 + $0x304] ss:$16 sps:$4 sm:$0xff]  }
 0x115   :  { %2497 = vmatprep.subr.bf16.mxu1 %v3783_v43 }
 0x117   :  { %2457 = vmatpush1.bf16.msra.mxu0 %v3715_v14 }
 0x118   :  { %2458 = vmatprep.subr.bf16.mxu0 %v3720_v34  ;;  %2498 = vmatpush1.bf16.msra.mxu1 %v3781_v42  ;;  %v294_v34 = vlaneseq }
 0x119   :  { %2499 = vmatprep.subr.bf16.mxu1 %v3789_v47 }
 0x11b   :  { %2459 = vmatpush1.bf16.msra.mxu0 %v3718_v35  ;;  %v4156_v35 = vshrl.u32 %v294_v34, 7 }
 0x11c   :  { %2460 = vmatprep.subr.bf16.mxu0 %v3723_v37  ;;  %2500 = vmatpush1.bf16.msra.mxu1 %v3787_v46 }
 0x11d   :  { %2501 = vmatprep.subr.bf16.mxu1 %v3795_v52  ;;  %v296_v6 = vsub.s32 0, %v4156_v35  ;;  %v300_v37 = vsub.s32 1, %v4156_v35 }
 0x11f   :  { %2461 = vmatpush1.bf16.msra.mxu0 %v3721_v38  ;;  %v297_v38 = vrot.slane %v4159_v36, %v296_v6  ;;  %v301_v39 = vrot.slane %v4159_v36, %v300_v37 }
 0x120   :  { %2462 = vmatprep.subr.bf16.mxu0 %v3726_v40  ;;  %2502 = vmatpush1.bf16.msra.mxu1 %v3793_v50 }
 0x121   :  { %2503 = vmatprep.subr.bf16.mxu1 %v3801_v56  ;;  %v3751_v56 = vld [vmem:[#allocation8 + $0xe8] ss:$16 sps:$4 sm:$0xff]  }
 0x123   :  { %2463 = vmatpush1.bf16.msra.mxu0 %v3724_v41 }
 0x124   :  { %2464 = vmatprep.subr.bf16.mxu0 %v3729_v44  ;;  %2504 = vmatpush1.bf16.msra.mxu1 %v3799_v55 }
 0x125   :  { %2505 = vmatprep.subr.bf16.mxu1 %v3807_v60 }
 0x127   :  { %2465 = vmatpush2.bf16.msra.mxu0 %v3727_v45 }
 0x128   :  { %2466 = vmatprep.subr.bf16.mxu0 %v3732_v48  ;;  %2506 = vmatpush2.bf16.msra.mxu1 %v3805_v59  ;;  %v3756_v59 = vld [vmem:[#allocation8 + $0xcc] ss:$16 sps:$4 sm:$0xff]  }
 0x129   :  { %2507 = vmatprep.subr.bf16.mxu1 %v3813_v0  ;;  %v3760_v0 = vld [vmem:[#allocation8 + $0xa8] ss:$16 sps:$4 sm:$0xff]  }
 0x12b   :  { %2467 = vmatpush2.bf16.msra.mxu0 %v3730_v49 }
 0x12c   :  { %2468 = vmatprep.subr.bf16.mxu0 %v3735_v53  ;;  %2508 = vmatpush2.bf16.msra.mxu1 %v3811_v63  ;;  %v3762_v63 = vld [vmem:[#allocation8 + $0xac] ss:$16 sps:$4 sm:$0xff]  }
 0x12d   :  { %2509 = vmatprep.subr.bf16.mxu1 %v3819_v4  ;;  %v3772_v4 = vld [vmem:[#allocation8 + $0x68] ss:$16 sps:$4 sm:$0xff]  }
 0x12f   :  { %2469 = vmatpush2.bf16.msra.mxu0 %v3733_v54 }
 0x130   :  { %2470 = vmatprep.subr.bf16.mxu0 %v3738_v57  ;;  %2510 = vmatpush2.bf16.msra.mxu1 %v3817_v3  ;;  %v3774_v3 = vld [vmem:[#allocation8 + $0x6c] ss:$16 sps:$4 sm:$0xff]  }
 0x131   :  { %2511 = vmatprep.subr.bf16.mxu1 %v3825_v10  ;;  %v3784_v10 = vld [vmem:[#allocation8 + $0x28] ss:$16 sps:$4 sm:$0xff]  }
 0x133   :  { %2471 = vmatpush2.bf16.msra.mxu0 %v3736_v58 }
 0x134   :  { %2472 = vmatprep.subr.bf16.mxu0 %v3741_v61  ;;  %2512 = vmatpush2.bf16.msra.mxu1 %v3823_v9  ;;  %v3754_v61 = vld [vmem:[#allocation8 + $0xc8] ss:$16 sps:$4 sm:$0xff]   ;;  %v3786_v9 = vld [vmem:[#allocation8 + $0x2c] ss:$16 sps:$4 sm:$0xff]  }
 0x135   :  { %2513 = vmatprep.subr.bf16.mxu1 %v3831_v17  ;;  %v3804_v17 = vld [vmem:[#allocation8 + $0x1cc] ss:$16 sps:$4 sm:$0xff]  }
 0x137   :  { %2473 = vmatpush2.bf16.msra.mxu0 %v3739_v62 }
 0x138   :  { %2474 = vmatprep.subr.bf16.mxu0 %v3744_v1  ;;  %2514 = vmatpush2.bf16.msra.mxu1 %v3829_v21  ;;  %v3768_v1 = vld [vmem:[#allocation8 + $0x8c] ss:$16 sps:$4 sm:$0xff]  }
 0x139   :  { %2515 = vmatprep.subr.bf16.mxu1 %v3837_v24  ;;  %v3816_v21 = vld [vmem:[#allocation8 + $0x18c] ss:$16 sps:$4 sm:$0xff]   ;;  %v3820_v24 = vld [vmem:[#allocation8 + $0x168] ss:$16 sps:$4 sm:$0xff]  }
 0x13b   :  { %2475 = vmatpush2.bf16.msra.mxu0 %v3742_v2  ;;  %v3766_v2 = vld [vmem:[#allocation8 + $0x88] ss:$16 sps:$4 sm:$0xff]  }
 0x13c   :  { %2476 = vmatprep.subr.bf16.mxu0 %v3747_v5  ;;  %2516 = vmatpush2.bf16.msra.mxu1 %v3835_v27  ;;  %v3780_v5 = vld [vmem:[#allocation8 + $0x4c] ss:$16 sps:$4 sm:$0xff]   ;;  %v3826_v27 = vld [vmem:[#allocation8 + $0x148] ss:$16 sps:$4 sm:$0xff]  }
 0x13d   :  { %2517 = vmatprep.subr.bf16.mxu1 %v3843_v28  ;;  %v308_v28 = vsub.s32 3, %v4156_v35 }
 0x13e   :  { %v1356_v12 = vpop.f32.mrf.mxu0 }
 0x13f   :  { %v1397_v15 = vpop.f32.mrf.mxu1  ;;  %2477 = vmatpush2.bf16.msra.mxu0 %v3745_v8  ;;  %v1357_v33 = vadd.f32 %v1356_v12, %v297_v38  ;;  %v3778_v8 = vld [vmem:[#allocation8 + $0x48] ss:$16 sps:$4 sm:$0xff]  }
 0x140   :  { %v1358_v18 = vpop.f32.mrf.mxu0  ;;  %2478 = vmatprep.subr.bf16.mxu0 %v3750_v11  ;;  %2518 = vmatpush2.bf16.msra.mxu1 %v3841_v13  ;;  %v3792_v11 = vld [vmem:[#allocation8 + $0xc] ss:$16 sps:$4 sm:$0xff]   ;;  %v3790_v12 = vld [vmem:[#allocation8 + $0x8] ss:$16 sps:$4 sm:$0xff]  }
 0x141   :  { %v1399_v19 = vpop.f32.mrf.mxu1  ;;  %2519 = vmatprep.subr.bf16.mxu1 %v3846_v31  ;;  %v1359_v40 = vadd.f32 %v1358_v18, %v301_v39  ;;  %v1398_v41 = vadd.f32 %v1397_v15, %v1357_v33  ;;  %v3798_v15 = vld [vmem:[#allocation8 + $0x1ec] ss:$16 sps:$4 sm:$0xff]   ;;  %v3802_v18 = vld [vmem:[#allocation8 + $0x1c8] ss:$16 sps:$4 sm:$0xff]  }
 0x142   :  { %v1360_v22 = vpop.f32.mrf.mxu0  ;;  %v3838_v38 = vld [vmem:[#allocation8 + $0x108] ss:$16 sps:$4 sm:$0xff]  }
 0x143   :  { %v1401_v23 = vpop.f32.mrf.mxu1  ;;  %2479 = vmatpush2.bf16.msra.mxu0 %v3748_v16  ;;  %v1400_v43 = vadd.f32 %v1399_v19, %v1359_v40  ;;  %v3796_v16 = vld [vmem:[#allocation8 + $0x1e8] ss:$16 sps:$4 sm:$0xff]   ;;  %v3810_v19 = vld [vmem:[#allocation8 + $0x1ac] ss:$16 sps:$4 sm:$0xff]  }
 0x144   :  { %v1361_v25 = vpop.f32.mrf.mxu0  ;;  %2530 = vmatprep.subr.bf16.mxu0 %v3753_v20  ;;  %2520 = vmatpush2.bf16.msra.mxu1 %v3844_v32  ;;  %v3808_v20 = vld [vmem:[#allocation8 + $0x1a8] ss:$16 sps:$4 sm:$0xff]   ;;  %v3822_v23 = vld [vmem:[#allocation8 + $0x16c] ss:$16 sps:$4 sm:$0xff]   ;;  %v309_v32 = vrot.slane %v4159_v36, %v308_v28 }
 0x145   :  { %v1402_v26 = vpop.f32.mrf.mxu1  ;;  %2571 = vmatprep.subr.bf16.mxu1 %v3849_v51  ;;  %v3814_v22 = vld [vmem:[#allocation8 + $0x188] ss:$16 sps:$4 sm:$0xff]   ;;  %v3828_v25 = vld [vmem:[#allocation8 + $0x14c] ss:$16 sps:$4 sm:$0xff]  }
 0x146   :  { %v304_v26 = vsub.s32 2, %v4156_v35 }
 0x147   :  { %v1479_v7 = vpop.f32.mrf.mxu1 }
 0x148   :  { %v305_v13 = vrot.slane %v4159_v36, %v304_v26 }
 0x149   :  { %v1481_v29 = vpop.f32.mrf.mxu1 }
 0x14b   :  { %v1483_v30 = vpop.f32.mrf.mxu1 }
 0x14c   :  { %v3832_v30 = vld [vmem:[#allocation8 + $0x128] ss:$16 sps:$4 sm:$0xff]  }
 0x14d   :  { %v1484_v14 = vpop.f32.mrf.mxu1 }
 0x14e   :  { %v3840_v14 = vld [vmem:[#allocation8 + $0x10c] ss:$16 sps:$4 sm:$0xff]  }
 0x17e   :  { %v1438_v42 = vpop.f32.mrf.mxu0 }
 0x17f   :  { %v1439_v44 = vadd.f32 %v1438_v42, %v1398_v41 }
 0x180   :  { %v1440_v45 = vpop.f32.mrf.mxu0 }
 0x181   :  { %v1480_v46 = vadd.f32 %v1479_v7, %v1439_v44  ;;  %v1441_v47 = vadd.f32 %v1440_v45, %v1400_v43  ;;  %v3834_v7 = vld [vmem:[#allocation8 + $0x12c] ss:$16 sps:$4 sm:$0xff]  }
 0x182   :  { %v1442_v48 = vpop.f32.mrf.mxu0 }
 0x183   :  { %v1482_v49 = vadd.f32 %v1481_v29, %v1441_v47  ;;  %v1650_v50 = vmax.f32 %v1480_v46, 0.0 }
 0x184   :  { %v1443_v52 = vpop.f32.mrf.mxu0 }
 0x185   :  { %v1651_v53 = vmax.f32 %v1482_v49, 0.0  ;;  %v4170_v57 = vpack.c.bf16 %v1650_v50, %v1650_v50 }
 0x187   :  { %v4168_v54 = vpop.f32.mrf.mxu1  ;;  %v1655_v55 = vpack.c.bf16 %v1651_v53, %v1651_v53 }
 0x188   :  { %v1521_v34 = vadd.f32 %v4168_v54, %v305_v13  ;;  %v3885_v13 = vld [vmem:[#allocation8 + $0x36c] ss:$16 sps:$4 sm:$0xff]  }
 0x189   :  { %v4172_v58 = vpop.f32.mrf.mxu1  ;;  %2480 = vmatprep.mubr.bf16.mxu0 %v1655_v55 }
 0x18a   :  { %2481 = vmatmul.mubr.bf16.vlgmr.msra.gmra.mxu0 %v4170_v57  ;;  %v1523_v33 = vadd.f32 %v4172_v58, %v309_v32  ;;  %v3847_v58 = vld [vmem:[#allocation8 + $0x2e8] ss:$16 sps:$4 sm:$0xff]   ;;  %v3891_v32 = vld [vmem:[#allocation8 + $0x32c] ss:$16 sps:$4 sm:$0xff]  }
 0x18b   :  { %v1524_v60 = vpop.f32.mrf.mxu1  ;;  %2531 = vmatpush1.bf16.msra.mxu0 %v3751_v56  ;;  %2562 = vmatprep.mubr.bf16.mxu0 %v1655_v55 }
 0x18c   :  { %2532 = vmatprep.subr.bf16.mxu0 %v3756_v59  ;;  %v3852_v60 = vld [vmem:[#allocation8 + $0x2cc] ss:$16 sps:$4 sm:$0xff]  }
 0x18d   :  { %v1525_v62 = vpop.f32.mrf.mxu1 }
 0x18e   :  { %v3896_v62 = vld [vmem:[#allocation10 + $0x38] sm:$0xff]  }
 0x18f   :  { %2533 = vmatpush1.bf16.msra.mxu0 %v3754_v61  ;;  %v3895_v61 = vld [vmem:[#allocation10 + $0x78] sm:$0xff]  }
 0x190   :  { %2534 = vmatprep.subr.bf16.mxu0 %v3762_v63  ;;  %v3897_v63 = vld [vmem:[#allocation10 + $0x70] sm:$0xff]  }
 0x193   :  { %2535 = vmatpush1.bf16.msra.mxu0 %v3760_v0  ;;  %v3855_v0 = vld [vmem:[#allocation8 + $0x2ac] ss:$16 sps:$4 sm:$0xff]  }
 0x194   :  { %2536 = vmatprep.subr.bf16.mxu0 %v3768_v1  ;;  %v3898_v1 = vld [vmem:[#allocation10 + $0x30] sm:$0xff]  }
 0x197   :  { %2537 = vmatpush1.bf16.msra.mxu0 %v3766_v2  ;;  %v3899_v2 = vld [vmem:[#allocation10 + $0x68] sm:$0xff]  }
 0x198   :  { %2538 = vmatprep.subr.bf16.mxu0 %v3774_v3  ;;  %v3853_v3 = vld [vmem:[#allocation8 + $0x2a8] ss:$16 sps:$4 sm:$0xff]  }
 0x19b   :  { %2539 = vmatpush1.bf16.msra.mxu0 %v3772_v4  ;;  %v3858_v4 = vld [vmem:[#allocation8 + $0x28c] ss:$16 sps:$4 sm:$0xff]  }
 0x19c   :  { %2540 = vmatprep.subr.bf16.mxu0 %v3780_v5  ;;  %v3900_v5 = vld [vmem:[#allocation10 + $0x28] sm:$0xff]  }
 0x19f   :  { %2541 = vmatpush1.bf16.msra.mxu0 %v3778_v8  ;;  %v3901_v8 = vld [vmem:[#allocation10 + $0x60] sm:$0xff]  }
 0x1a0   :  { %2542 = vmatprep.subr.bf16.mxu0 %v3786_v9  ;;  %v3856_v9 = vld [vmem:[#allocation8 + $0x288] ss:$16 sps:$4 sm:$0xff]  }
 0x1a3   :  { %2543 = vmatpush1.bf16.msra.mxu0 %v3784_v10  ;;  %v3861_v10 = vld [vmem:[#allocation8 + $0x26c] ss:$16 sps:$4 sm:$0xff]  }
 0x1a4   :  { %2544 = vmatprep.subr.bf16.mxu0 %v3792_v11  ;;  %v3902_v11 = vld [vmem:[#allocation10 + $0x20] sm:$0xff]  }
 0x1a7   :  { %2545 = vmatpush1.bf16.msra.mxu0 %v3790_v12  ;;  %v3859_v12 = vld [vmem:[#allocation8 + $0x268] ss:$16 sps:$4 sm:$0xff]  }
 0x1a8   :  { %2546 = vmatprep.subr.bf16.mxu0 %v3798_v15  ;;  %v3864_v15 = vld [vmem:[#allocation8 + $0x24c] ss:$16 sps:$4 sm:$0xff]  }
 0x1ab   :  { %2547 = vmatpush2.bf16.msra.mxu0 %v3796_v16  ;;  %v3862_v16 = vld [vmem:[#allocation8 + $0x248] ss:$16 sps:$4 sm:$0xff]  }
 0x1ac   :  { %2548 = vmatprep.subr.bf16.mxu0 %v3804_v17  ;;  %v3867_v17 = vld [vmem:[#allocation8 + $0x22c] ss:$16 sps:$4 sm:$0xff]  }
 0x1af   :  { %2549 = vmatpush2.bf16.msra.mxu0 %v3802_v18  ;;  %v3865_v18 = vld [vmem:[#allocation8 + $0x228] ss:$16 sps:$4 sm:$0xff]  }
 0x1b0   :  { %2550 = vmatprep.subr.bf16.mxu0 %v3810_v19  ;;  %v3870_v19 = vld [vmem:[#allocation8 + $0x20c] ss:$16 sps:$4 sm:$0xff]  }
 0x1b3   :  { %2551 = vmatpush2.bf16.msra.mxu0 %v3808_v20  ;;  %v3868_v20 = vld [vmem:[#allocation8 + $0x208] ss:$16 sps:$4 sm:$0xff]  }
 0x1b4   :  { %2552 = vmatprep.subr.bf16.mxu0 %v3816_v21  ;;  %v3873_v21 = vld [vmem:[#allocation8 + $0x3ec] ss:$16 sps:$4 sm:$0xff]  }
 0x1b7   :  { %2553 = vmatpush2.bf16.msra.mxu0 %v3814_v22  ;;  %v3871_v22 = vld [vmem:[#allocation8 + $0x3e8] ss:$16 sps:$4 sm:$0xff]  }
 0x1b8   :  { %2554 = vmatprep.subr.bf16.mxu0 %v3822_v23  ;;  %v3876_v23 = vld [vmem:[#allocation8 + $0x3cc] ss:$16 sps:$4 sm:$0xff]  }
 0x1bb   :  { %2555 = vmatpush2.bf16.msra.mxu0 %v3820_v24  ;;  %v3874_v24 = vld [vmem:[#allocation8 + $0x3c8] ss:$16 sps:$4 sm:$0xff]  }
 0x1bc   :  { %2556 = vmatprep.subr.bf16.mxu0 %v3828_v25  ;;  %v3879_v25 = vld [vmem:[#allocation8 + $0x3ac] ss:$16 sps:$4 sm:$0xff]  }
 0x1be   :  { %v1561_v29 = vpop.f32.mrf.mxu0 }
 0x1bf   :  { %2557 = vmatpush2.bf16.msra.mxu0 %v3826_v27  ;;  %v1562_v40 = vadd.f32 %v1561_v29, %v1521_v34  ;;  %v3877_v27 = vld [vmem:[#allocation8 + $0x3a8] ss:$16 sps:$4 sm:$0xff]   ;;  %v3894_v34 = vld [vmem:[#allocation8 + $0x30c] ss:$16 sps:$4 sm:$0xff]  }
 0x1c0   :  { %v1563_v31 = vpop.f32.mrf.mxu0  ;;  %2558 = vmatprep.subr.bf16.mxu0 %v3834_v7  ;;  %v3882_v7 = vld [vmem:[#allocation8 + $0x38c] ss:$16 sps:$4 sm:$0xff]   ;;  %v3880_v29 = vld [vmem:[#allocation8 + $0x388] ss:$16 sps:$4 sm:$0xff]  }
 0x1c1   :  { %v1564_v43 = vadd.f32 %v1563_v31, %v1523_v33  ;;  %v3888_v31 = vld [vmem:[#allocation8 + $0x34c] ss:$16 sps:$4 sm:$0xff]  }
 0x1c2   :  { %v1565_v51 = vpop.f32.mrf.mxu0  ;;  %v3904_v33 = vld [vmem:[#allocation10 + $0x18] sm:$0xff]  }
 0x1c3   :  { %2559 = vmatpush2.bf16.msra.mxu0 %v3832_v30  ;;  %v3883_v30 = vld [vmem:[#allocation8 + $0x368] ss:$16 sps:$4 sm:$0xff]  }
 0x1c4   :  { %v1566_v39 = vpop.f32.mrf.mxu0  ;;  %2560 = vmatprep.subr.bf16.mxu0 %v3840_v14  ;;  %v3886_v14 = vld [vmem:[#allocation8 + $0x348] ss:$16 sps:$4 sm:$0xff]  }
 0x1c5   :  { %v3889_v51 = vld [vmem:[#allocation8 + $0x328] ss:$16 sps:$4 sm:$0xff]  }
 0x1c6   :  { %v1643_v42 = vpop.f32.mrf.mxu0  ;;  %v3903_v39 = vld [vmem:[#allocation10 + $0x58] sm:$0xff]  }
 0x1c7   :  { %v1602_v41 = vpop.f32.mrf.mxu1  ;;  %2561 = vmatpush2.bf16.msra.mxu0 %v3838_v38  ;;  %v3892_v38 = vld [vmem:[#allocation8 + $0x308] ss:$16 sps:$4 sm:$0xff]  }
 0x1c8   :  { %v1603_v44 = vadd.f32 %v1602_v41, %v1562_v40  ;;  %v1645_v46 = vpop.f32.mrf.mxu0  ;;  %3347 = vmatprep.subr.bf16.mxu0 %v3895_v61  ;;  %v3905_v40 = vld [vmem:[#allocation10 + $0x50] sm:$0xff]  }
 0x1c9   :  { %v1604_v45 = vpop.f32.mrf.mxu1  ;;  %v3906_v41 = vld [vmem:[#allocation10 + $0x10] sm:$0xff]  }
 0x1ca   :  { %v1644_v47 = vadd.f32 %v1643_v42, %v1603_v44  ;;  %v1605_v48 = vadd.f32 %v1604_v45, %v1564_v43  ;;  %2563 = vmatmul.mubr.bf16.vlgmr.msra.gmra.mxu0 %v4170_v57  ;;  %v1647_v49 = vpop.f32.mrf.mxu0  ;;  %v3850_v57 = vld [vmem:[#allocation8 + $0x2c8] ss:$16 sps:$4 sm:$0xff]   ;;  %v3909_v44 = vld [vmem:[#allocation10 + $0x40] sm:$0xff]  }
 0x1cb   :  { %v1606_v36 = vpop.f32.mrf.mxu1  ;;  %3348 = vmatpush3.bf16.msra.mxu0 %v3896_v62  ;;  %v3907_v42 = vld [vmem:[#allocation10 + $0x48] sm:$0xff]   ;;  %v3910_v45 = vld [vmem:[#allocation10] sm:$0xff]  }
 0x1cc   :  { %v1646_v50 = vadd.f32 %v1645_v46, %v1605_v48  ;;  %v1652_v52 = vmax.f32 %v1644_v47, 0.0  ;;  %v1648_v54 = vpop.f32.mrf.mxu0  ;;  %3349 = vmatprep.subr.bf16.mxu0 %v3897_v63  ;;  %v3908_v43 = vld [vmem:[#allocation10 + $0x8] sm:$0xff]   ;;  %v3911_v46 = vld [vmem:[#allocation10 + $0xf8] sm:$0xff]   ;;  %v3913_v48 = vld [vmem:[#allocation10 + $0xf0] sm:$0xff]  }
 0x1cd   :  { %v1607_v53 = vpop.f32.mrf.mxu1  ;;  %v3912_v47 = vld [vmem:[#allocation10 + $0xb8] sm:$0xff]   ;;  %v3914_v36 = vld [vmem:[#allocation10 + $0xb0] sm:$0xff]   ;;  %v3915_v49 = vld [vmem:[#allocation10 + $0xe8] sm:$0xff]  }
 0x1ce   :  { %v1653_v55 = vmax.f32 %v1646_v50, 0.0  ;;  %v4186_v59 = vpack.c.bf16 %v1652_v52, %v1652_v52  ;;  %v3916_v50 = vld [vmem:[#allocation10 + $0xa8] sm:$0xff]   ;;  %v3917_v52 = vld [vmem:[#allocation10 + $0xe0] sm:$0xff]   ;;  %v3919_v54 = vld [vmem:[#allocation10 + $0xd8] sm:$0xff]  }
 0x1cf   :  { %3350 = vmatpush3.bf16.msra.mxu0 %v3898_v1  ;;  %v3918_v53 = vld [vmem:[#allocation10 + $0xa0] sm:$0xff]   ;;  %v3923_v63 = vld [vmem:[#allocation10 + $0xc8] sm:$0xff]  }
 0x1d0   :  { %v1657_v56 = vpack.c.bf16 %v1653_v55, %v1653_v55  ;;  %3351 = vmatprep.subr.bf16.mxu0 %v3899_v2  ;;  %v3920_v55 = vld [vmem:[#allocation10 + $0x98] sm:$0xff]   ;;  %v3926_v1 = vld [vmem:[#allocation10 + $0x80] sm:$0xff]  }
 0x1d1   :  { %v1786_v2 = vld [vmem:[%s4211_s4] sm:$0xf] }
 0x1d2   :  { %2521 = vmatprep.mubr.bf16.mxu1 %v1657_v56 }
 0x1d3   :  { %2522 = vmatmul.mubr.bf16.vlgmr.msra.gmra.mxu1 %v4186_v59  ;;  %3352 = vmatpush3.bf16.msra.mxu0 %v3900_v5  ;;  %v1791_v5 = vrot.slane %v1786_v2, %v296_v6  ;;  %v1799_v6 = vrot.slane %v1786_v2, %v304_v26 }
 0x1d4   :  { %2572 = vmatpush1.bf16.msra.mxu1 %v3847_v58  ;;  %2603 = vmatprep.mubr.bf16.mxu1 %v1657_v56  ;;  %v3921_v56 = vld [vmem:[#allocation10 + $0xd0] sm:$0xff]  }
 0x1d5   :  { %2573 = vmatprep.subr.bf16.mxu1 %v3852_v60  ;;  %3353 = vmatprep.subr.bf16.mxu0 %v3901_v8  ;;  %v3922_v58 = vld [vmem:[#allocation10 + $0x90] sm:$0xff]  }
 0x1d7   :  { %3354 = vmatpush3.bf16.msra.mxu0 %v3902_v11 }
 0x1d8   :  { %2574 = vmatpush1.bf16.msra.mxu1 %v3850_v57  ;;  %3355 = vmatprep.subr.bf16.mxu0 %v3903_v39  ;;  %v3924_v57 = vld [vmem:[#allocation10 + $0x88] sm:$0xff]  }
 0x1d9   :  { %2575 = vmatprep.subr.bf16.mxu1 %v3855_v0  ;;  %v3925_v0 = vld [vmem:[#allocation10 + $0xc0] sm:$0xff]  }
 0x1db   :  { %3356 = vmatpush3.bf16.msra.mxu0 %v3904_v33 }
 0x1dc   :  { %2576 = vmatpush1.bf16.msra.mxu1 %v3853_v3  ;;  %3357 = vmatprep.subr.bf16.mxu0 %v3905_v40 }
 0x1dd   :  { %2577 = vmatprep.subr.bf16.mxu1 %v3858_v4 }
 0x1df   :  { %3358 = vmatpush3.bf16.msra.mxu0 %v3906_v41 }
 0x1e0   :  { %2578 = vmatpush1.bf16.msra.mxu1 %v3856_v9  ;;  %3359 = vmatprep.subr.bf16.mxu0 %v3907_v42  ;;  %v1795_v9 = vrot.slane %v1786_v2, %v300_v37  ;;  %v1803_v37 = vrot.slane %v1786_v2, %v308_v28  ;;  %v3314_v28 = vld [vmem:[%s4213_s6] ss:$0 sm:$0xff] }
 0x1e1   :  { %2579 = vmatprep.subr.bf16.mxu1 %v3861_v10 }
 0x1e3   :  { %3360 = vmatpush3.bf16.msra.mxu0 %v3908_v43 }
 0x1e4   :  { %2580 = vmatpush1.bf16.msra.mxu1 %v3859_v12  ;;  %3361 = vmatprep.subr.bf16.mxu0 %v3909_v44 }
 0x1e5   :  { %2581 = vmatprep.subr.bf16.mxu1 %v3864_v15 }
 0x1e7   :  { %3362 = vmatpush3.bf16.msra.mxu0 %v3910_v45 }
 0x1e8   :  { %2582 = vmatpush1.bf16.msra.mxu1 %v3862_v16 }
 0x1e9   :  { %2583 = vmatprep.subr.bf16.mxu1 %v3867_v17 }
 0x1ec   :  { %2584 = vmatpush1.bf16.msra.mxu1 %v3865_v18 }
 0x1ed   :  { %2585 = vmatprep.subr.bf16.mxu1 %v3870_v19 }
 0x1f0   :  { %2586 = vmatpush1.bf16.msra.mxu1 %v3868_v20 }
 0x1f1   :  { %2587 = vmatprep.subr.bf16.mxu1 %v3873_v21 }
 0x1f4   :  { %2588 = vmatpush2.bf16.msra.mxu1 %v3871_v22 }
 0x1f5   :  { %2589 = vmatprep.subr.bf16.mxu1 %v3876_v23 }
 0x1f8   :  { %2590 = vmatpush2.bf16.msra.mxu1 %v3874_v24 }
 0x1f9   :  { %2591 = vmatprep.subr.bf16.mxu1 %v3879_v25 }
 0x1fc   :  { %2592 = vmatpush2.bf16.msra.mxu1 %v3877_v27 }
 0x1fd   :  { %2593 = vmatprep.subr.bf16.mxu1 %v3882_v7 }
 0x200   :  { %2594 = vmatpush2.bf16.msra.mxu1 %v3880_v29 }
 0x201   :  { %2595 = vmatprep.subr.bf16.mxu1 %v3885_v13 }
 0x204   :  { %2596 = vmatpush2.bf16.msra.mxu1 %v3883_v30 }
 0x205   :  { %2597 = vmatprep.subr.bf16.mxu1 %v3888_v31 }
 0x208   :  { %2598 = vmatpush2.bf16.msra.mxu1 %v3886_v14 }
 0x209   :  { %2599 = vmatprep.subr.bf16.mxu1 %v3891_v32 }
 0x20c   :  { %2600 = vmatpush2.bf16.msra.mxu1 %v3889_v51 }
 0x20d   :  { %2601 = vmatprep.subr.bf16.mxu1 %v3894_v34 }
 0x210   :  { %2602 = vmatpush2.bf16.msra.mxu1 %v3892_v38 }
 0x211   :  { %3369 = vmatprep.subr.bf16.mxu1 %v3911_v46 }
 0x213   :  { %2604 = vmatmul.mubr.bf16.vlgmr.msra.gmra.mxu1 %v4186_v59 }
 0x214   :  { %3370 = vmatpush3.bf16.msra.mxu1 %v3912_v47 }
 0x215   :  { %3371 = vmatprep.subr.bf16.mxu1 %v3913_v48 }
 0x218   :  { %3372 = vmatpush3.bf16.msra.mxu1 %v3914_v36 }
 0x219   :  { %3373 = vmatprep.subr.bf16.mxu1 %v3915_v49 }
 0x21c   :  { %3374 = vmatpush3.bf16.msra.mxu1 %v3916_v50 }
 0x21d   :  { %3375 = vmatprep.subr.bf16.mxu1 %v3917_v52 }
 0x220   :  { %3376 = vmatpush3.bf16.msra.mxu1 %v3918_v53 }
 0x221   :  { %3377 = vmatprep.subr.bf16.mxu1 %v3919_v54 }
 0x224   :  { %3378 = vmatpush3.bf16.msra.mxu1 %v3920_v55 }
 0x225   :  { %3379 = vmatprep.subr.bf16.mxu1 %v3921_v56 }
 0x228   :  { %3380 = vmatpush3.bf16.msra.mxu1 %v3922_v58 }
 0x229   :  { %3381 = vmatprep.subr.bf16.mxu1 %v3923_v63 }
 0x22c   :  { %3382 = vmatpush3.bf16.msra.mxu1 %v3924_v57 }
 0x22d   :  { %3383 = vmatprep.subr.bf16.mxu1 %v3925_v0 }
 0x230   :  { %3384 = vmatpush3.bf16.msra.mxu1 %v3926_v1 }
 0x24a   :  { %v2482_v59 = vpop.f32.mrf.mxu0 }
 0x24b   :  { %v2483_v11 = vadd.f32 %v2482_v59, %v1791_v5 }
 0x24c   :  { %v2484_v60 = vpop.f32.mrf.mxu0 }
 0x24d   :  { %v2485_v15 = vadd.f32 %v2484_v60, %v1795_v9 }
 0x24e   :  { %v2486_v61 = vpop.f32.mrf.mxu0 }
 0x250   :  { %v2487_v62 = vpop.f32.mrf.mxu0 }
 0x28a   :  { %v2564_v3 = vpop.f32.mrf.mxu0 }
 0x28b   :  { %v2565_v25 = vadd.f32 %v2564_v3, %v1799_v6 }
 0x28c   :  { %v2566_v4 = vpop.f32.mrf.mxu0 }
 0x28d   :  { %v2567_v7 = vadd.f32 %v2566_v4, %v1803_v37 }
 0x28e   :  { %v2568_v8 = vpop.f32.mrf.mxu0 }
 0x290   :  { %v2569_v10 = vpop.f32.mrf.mxu0 }
 0x293   :  { %v2523_v12 = vpop.f32.mrf.mxu1 }
 0x294   :  { %v2524_v16 = vadd.f32 %v2523_v12, %v2483_v11 }
 0x295   :  { %v2525_v17 = vpop.f32.mrf.mxu1 }
 0x296   :  { %v2526_v18 = vadd.f32 %v2525_v17, %v2485_v15  ;;  %v2612_v19 = vmax.f32 %v2524_v16, 0.0 }
 0x297   :  { %v2527_v20 = vpop.f32.mrf.mxu1 }
 0x298   :  { %v2613_v21 = vmax.f32 %v2526_v18, 0.0  ;;  %v2616_v24 = vpack.c.bf16 %v2612_v19, %v2612_v19 }
 0x299   :  { %v2528_v22 = vpop.f32.mrf.mxu1 }
 0x29a   :  { %v2617_v23 = vpack.c.bf16 %v2613_v21, %v2613_v21 }
 0x29c   :  { %2915 = vmatprep.mubr.bf16.mxu0 %v2617_v23 }
 0x29d   :  { %2916 = vmatmul.mubr.bf16.vlgmr.msra.gmra.mxu0 %v2616_v24 }
 0x2d3   :  { %v2605_v27 = vpop.f32.mrf.mxu1 }
 0x2d4   :  { %v2606_v29 = vadd.f32 %v2605_v27, %v2565_v25 }
 0x2d5   :  { %v2607_v13 = vpop.f32.mrf.mxu1 }
 0x2d6   :  { %v2608_v30 = vadd.f32 %v2607_v13, %v2567_v7  ;;  %v2614_v31 = vmax.f32 %v2606_v29, 0.0 }
 0x2d7   :  { %v2609_v14 = vpop.f32.mrf.mxu1 }
 0x2d8   :  { %v2615_v32 = vmax.f32 %v2608_v30, 0.0  ;;  %v2618_v38 = vpack.c.bf16 %v2614_v31, %v2614_v31 }
 0x2d9   :  { %v2610_v51 = vpop.f32.mrf.mxu1 }
 0x2da   :  { %v2619_v34 = vpack.c.bf16 %v2615_v32, %v2615_v32 }
 0x2dc   :  { %2955 = vmatprep.mubr.bf16.mxu1 %v2619_v34 }
 0x2dd   :  { %2956 = vmatmul.mubr.bf16.vlgmr.msra.gmra.mxu1 %v2618_v38 }
 0x35d   :  { %v3363_v39 = vpop.f32.mrf.mxu0 }
 0x35f   :  { %v3364_v33 = vpop.f32.mrf.mxu0 }
 0x360   :  { %v3365_v35 = vadd.f32 %v3364_v33, %v3363_v39 }
 0x361   :  { %v3366_v26 = vpop.f32.mrf.mxu0 }
 0x362   :  { %v2918_v43 = vadd.f32 %v3365_v35, %v3314_v28 }
 0x363   :  { %v3367_v40 = vpop.f32.mrf.mxu0 }
 0x39d   :  { %v3385_v41 = vpop.f32.mrf.mxu1 }
 0x39f   :  { %v3386_v42 = vpop.f32.mrf.mxu1 }
 0x3a0   :  { %v3387_v44 = vadd.f32 %v3386_v42, %v3385_v41 }
 0x3a1   :  { %v3388_v45 = vpop.f32.mrf.mxu1 }
 0x3a2   :  { %v2958_v46 = vadd.f32 %v3387_v44, %v2918_v43 }
 0x3a3   :  { %v3389_v47 = vpop.f32.mrf.mxu1 }
 0x3a4   :  { %2963 = vst [vmem:[#allocation11] sm:$0xff] %v2958_v46 }
 0x3a5   :  { %4039 = shalt.err (!%p4036_p1)
}
 0x3a6   :  { %2973 = dma.vmem_to_hbm [thread:$0]  %s2971_s29, 128, %s4214_s7, [#allocation4]  }
 0x3a7   :  { %4054 = dma.done.wait [#allocation4], 128  }
 0x3a8   :  { %4055 = vsyncadd [#allocation4], 4294967168 }
 0x3a9   :  { %2977 = vsyncpa [#allocation3], 1 }
 0x3aa   :  { %2978 = vsyncpa [#allocation6], 1 }
 0x3ab   :  { %2979 = vsyncpa [#allocation9], 1 }
 0x3ac   :  { %2980 = vsyncpa [#allocation4], 1 }

</bundles_post_ra>
